<compile_context>
chip_gen: v5e
topology: v5e:2x2
jax: 0.10.0
libtpu: 0.0.40
codegen_flags: <defaults>
</compile_context>

<pallas_src>
import jax
import jax.numpy as jnp
from jax.experimental import pallas as pl
from jax.experimental.pallas import tpu as pltpu


def mlp_kernel(x_ref, w1_ref, b1_ref, w2_ref, b2_ref, w3_ref, b3_ref, o_ref):
    # fc1 + ReLU  (bf16 MXU inputs, f32 accumulation, f32 elementwise)
    h1 = jnp.dot(x_ref[...], w1_ref[...], preferred_element_type=jnp.float32)
    h1 = jnp.maximum(h1 + b1_ref[...], 0.0)
    # fc2 + ReLU
    h2 = jnp.dot(h1.astype(jnp.bfloat16), w2_ref[...],
                 preferred_element_type=jnp.float32)
    h2 = jnp.maximum(h2 + b2_ref[...], 0.0)
    # fc3 (no activation)
    h3 = jnp.dot(h2.astype(jnp.bfloat16), w3_ref[...],
                 preferred_element_type=jnp.float32)
    o_ref[...] = (h3 + b3_ref[...]).astype(o_ref.dtype)


def _pad_to(a, axis, mult):
    pad = (-a.shape[axis]) % mult
    if pad == 0:
        return a
    widths = [(0, 0)] * a.ndim
    widths[axis] = (0, pad)
    return jnp.pad(a, widths)


def simple_mlp_forward(x, w1, b1, w2, b2, w3, b3, *, tm=128):
    B, _ = x.shape
    out_dim = w3.shape[1]

    # Zero-pad to MXU/lane-friendly shapes (zeros don't change the math).
    xp = _pad_to(_pad_to(x, 1, 128), 0, tm)        # [Bp, 896]
    w1p = _pad_to(w1, 0, 128)                      # [896, 256]
    w2p = _pad_to(w2, 1, 128)                      # [256, 128]
    b2p = _pad_to(b2, 1, 128)                      # [1, 128]
    w3p = _pad_to(_pad_to(w3, 0, 128), 1, 128)     # [128, 128]
    b3p = _pad_to(b3, 1, 128)                      # [1, 128]

    # bf16 only for the matmul operands; biases stay f32.
    x_bf = xp.astype(jnp.bfloat16)
    w1_bf = w1p.astype(jnp.bfloat16)
    w2_bf = w2p.astype(jnp.bfloat16)
    w3_bf = w3p.astype(jnp.bfloat16)

    Bp, Kp = x_bf.shape
    H1 = w1_bf.shape[1]
    H2 = w2_bf.shape[1]
    Np = w3_bf.shape[1]

    out = pl.pallas_call(
        mlp_kernel,
        out_shape=jax.ShapeDtypeStruct((Bp, Np), jnp.float32),
        grid=(Bp // tm,),
        in_specs=[
            pl.BlockSpec((tm, Kp), lambda i: (i, 0)),   # x: tiled over batch
            pl.BlockSpec((Kp, H1), lambda i: (0, 0)),   # weights: VMEM-resident
            pl.BlockSpec((1, H1), lambda i: (0, 0)),
            pl.BlockSpec((H1, H2), lambda i: (0, 0)),
            pl.BlockSpec((1, H2), lambda i: (0, 0)),
            pl.BlockSpec((H2, Np), lambda i: (0, 0)),
            pl.BlockSpec((1, Np), lambda i: (0, 0)),
        ],
        out_specs=pl.BlockSpec((tm, Np), lambda i: (i, 0)),
        compiler_params=pltpu.CompilerParams(
            dimension_semantics=("parallel",)),
    )(x_bf, w1_bf, b1, w2_bf, b2p, w3_bf, b3p)

    return out[:B, :out_dim]


def init_params(key):
    # Deterministic init mimicking nn.Linear defaults (uniform(-1/sqrt(fan_in), +)).
    dims = [(784, 256), (256, 100), (100, 10)]
    params = []
    for fan_in, fan_out in dims:
        kw, kb, key = jax.random.split(key, 3)
        bound = 1.0 / jnp.sqrt(jnp.float32(fan_in))
        w = jax.random.uniform(kw, (fan_in, fan_out), jnp.float32, -bound, bound)
        b = jax.random.uniform(kb, (1, fan_out), jnp.float32, -bound, bound)
        params += [w, b]
    return params


def _ref_forward(x, w1, b1, w2, b2, w3, b3):
    # Emulates the kernel's numerics: bf16-rounded matmul operands, f32 accumulation,
    # f32 bias/ReLU.
    bf = lambda a: a.astype(jnp.bfloat16).astype(jnp.float32)
    hi = jax.lax.Precision.HIGHEST
    h = jnp.maximum(jnp.dot(bf(x), bf(w1), precision=hi) + b1, 0.0)
    h = jnp.maximum(jnp.dot(bf(h), bf(w2), precision=hi) + b2, 0.0)
    return jnp.dot(bf(h), bf(w3), precision=hi) + b3


if __name__ == "__main__":
    key = jax.random.PRNGKey(0)
    kx, kp = jax.random.split(key)
    B = 256  # two 128-row tiles -> exercises the batch grid / megacore sharding
    x = jax.random.normal(kx, (B, 784), dtype=jnp.float32)
    w1, b1, w2, b2, w3, b3 = init_params(kp)

    out = simple_mlp_forward(x, w1, b1, w2, b2, w3, b3)
    out = jax.block_until_ready(out)

    ref = _ref_forward(x, w1, b1, w2, b2, w3, b3)
    assert out.shape == (B, 10)
    assert jnp.allclose(out, ref, atol=1e-2, rtol=1e-2)
    print("KERNEL_OK")
</pallas_src>

<mosaic_0001>
module attributes {stable_mosaic.version = 11 : i64} {
  func.func @mlp_kernel(%arg0: i32, %arg1: memref<128x896xbf16, #tpu.memory_space<vmem>>, %arg2: memref<896x256xbf16, #tpu.memory_space<vmem>>, %arg3: memref<1x256xf32, #tpu.memory_space<vmem>>, %arg4: memref<256x128xbf16, #tpu.memory_space<vmem>>, %arg5: memref<1x128xf32, #tpu.memory_space<vmem>>, %arg6: memref<128x128xbf16, #tpu.memory_space<vmem>>, %arg7: memref<1x128xf32, #tpu.memory_space<vmem>>, %arg8: memref<128x128xf32, #tpu.memory_space<vmem>>) attributes {dimension_semantics = [#tpu.dimension_semantics<parallel>], iteration_bounds = array<i64: 2>, scalar_prefetch = 0 : i64, scratch_operands = 0 : i64, tpu.core_type = #tpu.core_type<tc>, window_params = [{transform_indices = @transform_0, window_bounds = array<i64: 128, 896>}, {pipeline_mode = #tpu.pipeline_mode<synchronous>, transform_indices = @transform_1, window_bounds = array<i64: 896, 256>}, {pipeline_mode = #tpu.pipeline_mode<synchronous>, transform_indices = @transform_2, window_bounds = array<i64: 1, 256>}, {pipeline_mode = #tpu.pipeline_mode<synchronous>, transform_indices = @transform_3, window_bounds = array<i64: 256, 128>}, {pipeline_mode = #tpu.pipeline_mode<synchronous>, transform_indices = @transform_4, window_bounds = array<i64: 1, 128>}, {pipeline_mode = #tpu.pipeline_mode<synchronous>, transform_indices = @transform_5, window_bounds = array<i64: 128, 128>}, {pipeline_mode = #tpu.pipeline_mode<synchronous>, transform_indices = @transform_6, window_bounds = array<i64: 1, 128>}, {transform_indices = @transform_7, window_bounds = array<i64: 128, 128>}]} {
    %c0 = arith.constant 0 : index
    %c0_0 = arith.constant 0 : index
    %0 = vector.load %arg1[%c0, %c0_0] : memref<128x896xbf16, #tpu.memory_space<vmem>>, vector<128x896xbf16>
    %c0_1 = arith.constant 0 : index
    %c0_2 = arith.constant 0 : index
    %1 = vector.load %arg2[%c0_1, %c0_2] : memref<896x256xbf16, #tpu.memory_space<vmem>>, vector<896x256xbf16>
    %cst = arith.constant dense<0.000000e+00> : vector<128x256xf32>
    %2 = tpu.matmul %0, %1, %cst {dimension_numbers = #tpu.dot_dimension_numbers<[1], [0], [0], [1], [0, 0, 1, 1], [], []>} : vector<128x896xbf16>, vector<896x256xbf16>, vector<128x256xf32> -> vector<128x256xf32>
    %c0_3 = arith.constant 0 : index
    %c0_4 = arith.constant 0 : index
    %3 = vector.load %arg3[%c0_3, %c0_4] : memref<1x256xf32, #tpu.memory_space<vmem>>, vector<1x256xf32>
    %4 = vector.broadcast %3 : vector<1x256xf32> to vector<128x256xf32>
    %5 = arith.addf %2, %4 : vector<128x256xf32>
    %cst_5 = arith.constant 0.000000e+00 : f32
    %6 = vector.broadcast %cst_5 : f32 to vector<128x256xf32>
    %7 = arith.maximumf %5, %6 : vector<128x256xf32>
    %8 = arith.truncf %7 : vector<128x256xf32> to vector<128x256xbf16>
    %c0_6 = arith.constant 0 : index
    %c0_7 = arith.constant 0 : index
    %9 = vector.load %arg4[%c0_6, %c0_7] : memref<256x128xbf16, #tpu.memory_space<vmem>>, vector<256x128xbf16>
    %cst_8 = arith.constant dense<0.000000e+00> : vector<128x128xf32>
    %10 = tpu.matmul %8, %9, %cst_8 {dimension_numbers = #tpu.dot_dimension_numbers<[1], [0], [0], [1], [0, 0, 1, 1], [], []>} : vector<128x256xbf16>, vector<256x128xbf16>, vector<128x128xf32> -> vector<128x128xf32>
    %c0_9 = arith.constant 0 : index
    %c0_10 = arith.constant 0 : index
    %11 = vector.load %arg5[%c0_9, %c0_10] : memref<1x128xf32, #tpu.memory_space<vmem>>, vector<1x128xf32>
    %12 = vector.broadcast %11 : vector<1x128xf32> to vector<128x128xf32>
    %13 = arith.addf %10, %12 : vector<128x128xf32>
    %cst_11 = arith.constant 0.000000e+00 : f32
    %14 = vector.broadcast %cst_11 : f32 to vector<128x128xf32>
    %15 = arith.maximumf %13, %14 : vector<128x128xf32>
    %16 = arith.truncf %15 : vector<128x128xf32> to vector<128x128xbf16>
    %c0_12 = arith.constant 0 : index
    %c0_13 = arith.constant 0 : index
    %17 = vector.load %arg6[%c0_12, %c0_13] : memref<128x128xbf16, #tpu.memory_space<vmem>>, vector<128x128xbf16>
    %cst_14 = arith.constant dense<0.000000e+00> : vector<128x128xf32>
    %18 = tpu.matmul %16, %17, %cst_14 {dimension_numbers = #tpu.dot_dimension_numbers<[1], [0], [0], [1], [0, 0, 1, 1], [], []>} : vector<128x128xbf16>, vector<128x128xbf16>, vector<128x128xf32> -> vector<128x128xf32>
    %c0_15 = arith.constant 0 : index
    %c0_16 = arith.constant 0 : index
    %19 = vector.load %arg7[%c0_15, %c0_16] : memref<1x128xf32, #tpu.memory_space<vmem>>, vector<1x128xf32>
    %20 = vector.broadcast %19 : vector<1x128xf32> to vector<128x128xf32>
    %21 = arith.addf %18, %20 : vector<128x128xf32>
    %c0_17 = arith.constant 0 : index
    %c0_18 = arith.constant 0 : index
    %22 = vector.load %arg8[%c0_17, %c0_18] : memref<128x128xf32, #tpu.memory_space<vmem>>, vector<128x128xf32>
    tpu.vector_store %arg8[%c0_17, %c0_18], %21 {strides = array<i32>} : memref<128x128xf32, #tpu.memory_space<vmem>>, vector<128x128xf32>,
    return
  }
  func.func @transform_0(%arg0: i32) -> (i32, i32) {
    %c0_i32 = arith.constant 0 : i32
    %c0_i32_0 = arith.constant 0 : i32
    return %arg0, %c0_i32 : i32, i32
  }
  func.func @transform_1(%arg0: i32) -> (i32, i32) {
    %c0_i32 = arith.constant 0 : i32
    %c0_i32_0 = arith.constant 0 : i32
    %c0_i32_1 = arith.constant 0 : i32
    return %c0_i32, %c0_i32_0 : i32, i32
  }
  func.func @transform_2(%arg0: i32) -> (i32, i32) {
    %c0_i32 = arith.constant 0 : i32
    %c0_i32_0 = arith.constant 0 : i32
    %c0_i32_1 = arith.constant 0 : i32
    return %c0_i32, %c0_i32_0 : i32, i32
  }
  func.func @transform_3(%arg0: i32) -> (i32, i32) {
    %c0_i32 = arith.constant 0 : i32
    %c0_i32_0 = arith.constant 0 : i32
    %c0_i32_1 = arith.constant 0 : i32
    return %c0_i32, %c0_i32_0 : i32, i32
  }
  func.func @transform_4(%arg0: i32) -> (i32, i32) {
    %c0_i32 = arith.constant 0 : i32
    %c0_i32_0 = arith.constant 0 : i32
    %c0_i32_1 = arith.constant 0 : i32
    return %c0_i32, %c0_i32_0 : i32, i32
  }
  func.func @transform_5(%arg0: i32) -> (i32, i32) {
    %c0_i32 = arith.constant 0 : i32
    %c0_i32_0 = arith.constant 0 : i32
    %c0_i32_1 = arith.constant 0 : i32
    return %c0_i32, %c0_i32_0 : i32, i32
  }
  func.func @transform_6(%arg0: i32) -> (i32, i32) {
    %c0_i32 = arith.constant 0 : i32
    %c0_i32_0 = arith.constant 0 : i32
    %c0_i32_1 = arith.constant 0 : i32
    return %c0_i32, %c0_i32_0 : i32, i32
  }
  func.func @transform_7(%arg0: i32) -> (i32, i32) {
    %c0_i32 = arith.constant 0 : i32
    %c0_i32_0 = arith.constant 0 : i32
    return %arg0, %c0_i32 : i32, i32
  }
}

</mosaic_0001>

<bundles_post_ra>
// kernel: tpu_custom_call.1
= control target key start
LH: loop header
LB: loop body
LE: loop exit
PB: predicated region body
PF: predicated region fallthrough
CT: control target
= control target key end

     0   :  { %s4838_s0 = inlined_call_operand.hbm [shape: bf16[256,896], index: 0, kind: input, shape index: {}]   ;;  %s4839_s1 = inlined_call_operand.hbm [shape: bf16[896,256], index: 1, kind: input, shape index: {}]   ;;  %s4840_s2 = inlined_call_operand.hbm [shape: f32[1,256], index: 2, kind: input, shape index: {}]   ;;  %s4841_s3 = inlined_call_operand.hbm [shape: bf16[256,128], index: 3, kind: input, shape index: {}]   ;;  %s4842_s4 = inlined_call_operand.vmem [shape: f32[1,128], index: 4, kind: input, shape index: {}]   ;;  %s4843_s5 = inlined_call_operand.hbm [shape: bf16[128,128], index: 5, kind: input, shape index: {}]   ;;  %s4844_s6 = inlined_call_operand.vmem [shape: f32[1,128], index: 6, kind: input, shape index: {}]   ;;  %s4845_s7 = inlined_call_operand.hbm [shape: f32[256,128], index: 7, kind: output, shape index: {}]  }
   0x1   :  { %4865 = sst [smem:[#allocation35_spill]] %s4839_s1 }
   0x2   :  { %4866 = sst [smem:[#allocation36_spill]] %s4840_s2 }
   0x3   :  { %4867 = sst [smem:[#allocation37_spill]] %s4841_s3 }
   0x4   :  { %12 = vsyncpa [#allocation3], 0 }
   0x5   :  { %14 = vsyncpa [#allocation3 + $0x1], 0 }
   0x6   :  { %15 = vsyncpa [#allocation6], 0 }
   0x7   :  { %16 = vsyncpa [#allocation9], 0 }
   0x8   :  { %17 = vsyncpa [#allocation4], 0 }
   0x9   :  { %19 = vsyncpa [#allocation4 + $0x1], 0  ;;  %s4028_s24 = smov 0   ;;  %s4030_s25 = smov 0  }
   0xa   :  { %s4032_s26 = smov 0   ;;  %s4034_s27 = smov 0  }
   0xb LB: > { %s4049_s28 = sadd.s32 4294967295, %s3974_s27   ;;  %s2644_s29 = sadd.s32 4294967294, %s3974_s27   ;;  %s3974_s27 = sphi %s4034_s27, %s4919_s27   ;;  %s3970_s26 = sphi %s4032_s26, %s4918_s26   ;;  %s3966_s25 = sphi %s4030_s25, %s4917_s25   ;;  %s3962_s24 = sphi %s4028_s24, %s4916_s24  }
   0xc   : > { %p45_p0 = scmp.ne.s32.totalorder %s3966_s25, %s3962_s24  ;;  %p46_p1 = scmp.eq.s32.totalorder %s4049_s28, 0 }
   0xd   : > { %p195_p2 = scmp.eq.s32.totalorder %s4049_s28, 1  ;;  %p201_p3 = scmp.eq.s32.totalorder %s2644_s29, 1 }
   0xe   : > { %p4058_p4 = por %p46_p1, %p45_p0  ;;  %p2645_p5 = scmp.ge.s32.totalorder %s3974_s27, 1 }
   0xf   : > { %p4063_p6 = por %p201_p3, %p45_p0  ;;  %p208_p7 = scmp.lt.s32.totalorder %s3974_s27, 3 }
  0x10   : > { %s4870_s1 = sld [smem:[#allocation35_spill]]  ;;  %s3976_s13 = smov [#allocation5]  }
  0x11   : > { %p4071_p8 = pnand %p2645_p5, %p208_p7  ;;  %s221_s14 = sshll.u32 %s3976_s13, 4  ;;  %s222_s14 = int_to_ptr.vmem [resolvable:$true] %s221_s14 }
  0x12   : > { %s4873_s3 = sld [smem:[#allocation37_spill]]  ;;  %s3977_s19 = smov 128  }
  0x13   : > { %p3673_p9 = pneg %p4071_p8  ;;  %s3978_s20 = smov 8  }
  0x14   : > { %s3979_s21 = smov [#allocation8]   ;;  %s3980_s23 = smov 64  }
  0x15   : > { %p4079_p10 = pnand %p3673_p9, %p46_p1  ;;  %s247_s22 = sshll.u32 %s3979_s21, 4  ;;  %s248_s22 = int_to_ptr.vmem [resolvable:$true] %s247_s22 }
  0x16   : > { %s219_s11 = sshll.u32 %s4870_s1, 4  ;;  %s3981_s29 = smov 4   ;;  %s220_s11 = int_to_ptr.hbm [resolvable:$true] %s219_s11 }
  0x17   : > { %3676 = dma.hbm_to_vmem [thread:$0]  (!%p4079_p10), %s220_s11, 14336, %s222_s14, [#allocation6], %s3977_s19, %s3977_s19, %s3978_s20  }
  0x18   : > { %s245_s18 = sshll.u32 %s4873_s3, 4  ;;  %s4874_s2 = sld [smem:[#allocation36_spill]]  ;;  %s246_s18 = int_to_ptr.hbm [resolvable:$true] %s245_s18 }
  0x19   : > { %3682 = dma.hbm_to_vmem [thread:$0]  (!%p4079_p10), %s246_s18, 2048, %s248_s22, [#allocation9], %s3980_s23, %s3980_s23, %s3981_s29  }
  0x1a   : > { %s3982_s11 = smov [#allocation7]   ;;  %s262_s19 = sshll.u32 %s4843_s5, 4  ;;  %s263_s19 = int_to_ptr.hbm [resolvable:$true] %s262_s19 }
  0x1b   : > { %s236_s14 = sshll.u32 %s3982_s11, 4  ;;  %s3983_s18 = smov [#allocation10]   ;;  %s237_s14 = int_to_ptr.vmem [resolvable:$true] %s236_s14 }
  0x1c   : > { %s264_s20 = sshll.u32 %s3983_s18, 4  ;;  %s4102_s21 = sadd.s32 1, %s3974_s27   ;;  %s265_s20 = int_to_ptr.vmem [resolvable:$true] %s264_s20 }
  0x1d   : > { %3685 = dma.hbm_to_vmem [thread:$0]  (!%p4079_p10), %s263_s19, 1024, %s265_s20, [#allocation9], %s3980_s23, %s3980_s23, %s3981_s29  }
  0x1e   : > { %s234_s13 = sshll.u32 %s4874_s2, 4  ;;  %s32_s22 = sadd.s32 1, %s3970_s26  ;;  %s235_s13 = int_to_ptr.hbm [resolvable:$true] %s234_s13 }
  0x1f   : > { %3679 = dma.hbm_to_vmem [thread:$0]  (!%p4079_p10), %s235_s13, 32, %s237_s14, [#allocation6]  }
  0x20   : > { %s29_s9 = ssub.s32 %s3974_s27, %s4102_s21  ;;  %p39_p12 = scmp.ne.s32.totalorder %s3970_s26, %s3966_s25 }
  0x21   : > { %p30_p13 = scmp.eq.s32.totalorder %s29_s9, 0  ;;  %p40_p0 = scmp.eq.s32.totalorder %s3974_s27, 0 }
  0x22   : > { %p4112_p3 = por %p195_p2, %p39_p12  ;;  %p3698_p5 = scmp.lt.s32.totalorder %s3974_s27, 2 }
  0x23   : > { %s4118_s13 = scalar_select %p30_p13, %s3970_s26, %s32_s22  }
  0x24   : > { %p41_p7 = por %p40_p0, %p39_p12  ;;  %s281_s11 = sand.u32 1, %s3970_s26  }
  0x25   : > { %s3650_s15 = smul.u32 448, %s281_s11  ;;  %s282_s22 = scalar_lea.sflag [#allocation3], %s281_s11 }
  0x26   : > { %s3651_s23 = smul.u32 448, %s3974_s27  ;;  %p4122_p9 = pnand %p3698_p5, %p41_p7 }
  0x27   : > { %s285_s19 = scalar_lea.vmem [#allocation2], %s3650_s15  ;;  %s3877_s14 = scalar_lea.hbm %s4838_s0, 896 }
  0x28   : > { %s291_s17 = scalar_lea.hbm %s4838_s0, %s3651_s23  ;;  %s294_s18 = sshll.u32 %s285_s19, 4  ;;  %s295_s18 = int_to_ptr.vmem [resolvable:$true] %s294_s18 }
  0x29   : > { %s292_s20 = sshll.u32 %s291_s17, 4  ;;  %p3874_p10 = pneg %p4122_p9  ;;  %s293_s20 = int_to_ptr.hbm [resolvable:$true] %s292_s20 }
  0x2a   : > { %s3870_s9 = sshra.s32 %s293_s20, 4  ;;  %s3871_s9 = int_to_ptr.hbm [resolvable:$true] %s3870_s9 }
  0x2b   : > { %s3872_s1 = scalar_lea.hbm %s3871_s9, 448  ;;  %p3878_p0 = scmp.lt.s32.totalorder %s3871_s9, %s4838_s0 }
  0x2c   : > { %p3873_p2 = scmp.ne.s32.totalorder %s3871_s9, %s3872_s1  ;;  %p3879_p5 = scmp.lt.s32.totalorder %s3877_s14, %s3872_s1 }
  0x2e   : > { %p3875_p12 = pnand %p3874_p10, %p3873_p2  ;;  %p3880_p7 = por %p3879_p5, %p3878_p0 }
  0x30   : > { %p3876_p13 = pneg %p3875_p12 }
  0x32   : > { %p3881_p11 = pnand %p3880_p7, %p3876_p13 }
  0x34   : > { %3884 = shalt.err (!%p3881_p11)
}
  0x35   : > { %s3984_s11 = smov 448   ;;  %s3985_s15 = smov 28  }
  0x36   : > { %3689 = dma.hbm_to_vmem [thread:$0]  (!%p4122_p9), %s293_s20, 7168, %s295_s18, %s282_s22, %s3984_s11, %s3984_s11, %s3985_s15  }
  0x37   : > { %306 = sbr.rel (%p4071_p8) target bundleno = 1057 (0x421), region = 48 }
  0x3c   : > { %s4142_s2 = sand.u32 1, %s3966_s25  }
  0x3d   : > { %s3652_s3 = smul.u32 448, %s4142_s2  ;;  %s309_s17 = scalar_lea.sflag [#allocation3], %s4142_s2 }
  0x3f   : > { %s4146_s1 = scalar_lea.vmem [#allocation2], %s3652_s3 }
  0x40   : > { %3945 = dma.done.wait (%p4058_p4), %s309_s17, 7168  }
  0x41   : > { %3947 = vsyncadd (%p4058_p4), %s309_s17, 4294960128 }
  0x42   : > { %3949 = dma.done.wait (%p46_p1), [#allocation6], 14368  }
  0x43   : > { %3951 = vsyncadd (%p46_p1), [#allocation6], 4294952928 }
  0x44   : > { %3953 = dma.done.wait (%p46_p1), [#allocation9], 3072  }
  0x45   : > { %3955 = vsyncadd (%p46_p1), [#allocation9], 4294964224  ;;  %v2942_v0 = vld [vmem:[#allocation5 + $0x70] sm:$0xf]  ;;  %v3504_v1 = vld [vmem:[#allocation5 + $0x74] sm:$0xf0] }
  0x46   : > { %v2934_v2 = vld [vmem:[#allocation5 + $0x60] sm:$0xf]  ;;  %v2943_v3 = vor.u32 %v3504_v1, %v2942_v0  ;;  %v3502_v4 = vld [vmem:[#allocation5 + $0x64] sm:$0xf0]  ;;  %v2926_v6 = vld [vmem:[#allocation5 + $0x50] sm:$0xf] }
  0x47   : > { %v2935_v5 = vor.u32 %v3502_v4, %v2934_v2  ;;  %v3500_v7 = vld [vmem:[#allocation5 + $0x54] sm:$0xf0]  ;;  %v2918_v9 = vld [vmem:[#allocation5 + $0x40] sm:$0xf]  ;;  %v3498_v10 = vld [vmem:[#allocation5 + $0x44] sm:$0xf0] }
  0x48   : > { %3626 = vmatpush.bf16.msra.mxu1 %v2943_v3  ;;  %3627 = vmatpush.bf16.msra.mxu2 %v2943_v3  ;;  %v2927_v8 = vor.u32 %v3500_v7, %v2926_v6  ;;  %v2919_v11 = vor.u32 %v3498_v10, %v2918_v9  ;;  %v2910_v12 = vld [vmem:[#allocation5 + $0x30] sm:$0xf]  ;;  %v3496_v13 = vld [vmem:[#allocation5 + $0x34] sm:$0xf0]  ;;  %v2902_v15 = vld [vmem:[#allocation5 + $0x20] sm:$0xf] }
  0x49   : > { %3628 = vmatpush.bf16.msra.mxu3 %v2943_v3  ;;  %1396 = vmatpush.bf16.msra.mxu0 %v2943_v3  ;;  %v2911_v14 = vor.u32 %v3496_v13, %v2910_v12  ;;  %v3494_v16 = vld [vmem:[#allocation5 + $0x24] sm:$0xf0]  ;;  %v2894_v18 = vld [vmem:[#allocation5 + $0x10] sm:$0xf]  ;;  %v3492_v19 = vld [vmem:[#allocation5 + $0x14] sm:$0xf0] }
  0x4a   : > { %v2903_v17 = vor.u32 %v3494_v16, %v2902_v15  ;;  %v2895_v20 = vor.u32 %v3492_v19, %v2894_v18  ;;  %v2886_v21 = vld [vmem:[#allocation5] sm:$0xf]  ;;  %v3490_v22 = vld [vmem:[#allocation5 + $0x4] sm:$0xf0]  ;;  %v2718_v23 = vld [vmem:[%s4146_s1 + $0x70] sm:$0xf] }
  0x4b   : > { %v3450_v24 = vld [vmem:[%s4146_s1 + $0x88] sm:$0xf0]  ;;  %v3006_v25 = vld [vmem:[#allocation5 + $0xf0] sm:$0xf]  ;;  %v3520_v26 = vld [vmem:[#allocation5 + $0xf4] sm:$0xf0]  ;;  %v2887_v31 = vor.u32 %v3490_v22, %v2886_v21 }
  0x4c   : > { %3629 = vmatpush.bf16.msra.mxu1 %v2935_v5  ;;  %3630 = vmatpush.bf16.msra.mxu2 %v2935_v5  ;;  %v3070_v27 = vld [vmem:[#allocation5 + $0x170] sm:$0xf]  ;;  %v3536_v28 = vld [vmem:[#allocation5 + $0x174] sm:$0xf0]  ;;  %v2774_v32 = vld [vmem:[%s4146_s1 + $0xe0] sm:$0xf]  ;;  %v3007_v35 = vor.u32 %v3520_v26, %v3006_v25  ;;  %v4166_v44 = vor.u32 %v3450_v24, %v2718_v23 }
  0x4d   : > { %3631 = vmatpush.bf16.msra.mxu3 %v2935_v5  ;;  %1397 = vmatpush.bf16.msra.mxu0 %v2935_v5  ;;  %v3134_v29 = vld [vmem:[#allocation5 + $0x1f0] sm:$0xf]  ;;  %v3552_v30 = vld [vmem:[#allocation5 + $0x1f4] sm:$0xf0]  ;;  %v3464_v33 = vld [vmem:[%s4146_s1 + $0xf8] sm:$0xf0]  ;;  %v3071_v39 = vor.u32 %v3536_v28, %v3070_v27 }
  0x4e   : > { %v2830_v34 = vld [vmem:[%s4146_s1 + $0x150] sm:$0xf]  ;;  %v3478_v36 = vld [vmem:[%s4146_s1 + $0x168] sm:$0xf0]  ;;  %v2998_v37 = vld [vmem:[#allocation5 + $0xe0] sm:$0xf]  ;;  %v3135_v40 = vor.u32 %v3552_v30, %v3134_v29  ;;  %v4168_v45 = vor.u32 %v3464_v33, %v2774_v32 }
  0x4f   : > { %v3518_v38 = vld [vmem:[#allocation5 + $0xe4] sm:$0xf0]  ;;  %v3062_v41 = vld [vmem:[#allocation5 + $0x160] sm:$0xf]  ;;  %v3198_v42 = vld [vmem:[#allocation5 + $0x270] sm:$0xf]  ;;  %v4170_v49 = vor.u32 %v3478_v36, %v2830_v34 }
  0x50   : > { %3632 = vmatpush.bf16.msra.mxu1 %v2927_v8  ;;  %3633 = vmatpush.bf16.msra.mxu2 %v2927_v8  ;;  %v3568_v43 = vld [vmem:[#allocation5 + $0x274] sm:$0xf0]  ;;  %v3534_v46 = vld [vmem:[#allocation5 + $0x164] sm:$0xf0]  ;;  %v3126_v47 = vld [vmem:[#allocation5 + $0x1e0] sm:$0xf]  ;;  %v2999_v53 = vor.u32 %v3518_v38, %v2998_v37 }
  0x51   : > { %3634 = vmatpush.bf16.msra.mxu3 %v2927_v8  ;;  %1398 = vmatpush.bf16.msra.mxu0 %v2927_v8  ;;  %v3550_v48 = vld [vmem:[#allocation5 + $0x1e4] sm:$0xf0]  ;;  %v2990_v50 = vld [vmem:[#allocation5 + $0xd0] sm:$0xf]  ;;  %v2662_v51 = vld [vmem:[%s4146_s1] sm:$0xf]  ;;  %v3199_v55 = vor.u32 %v3568_v43, %v3198_v42  ;;  %v3063_v56 = vor.u32 %v3534_v46, %v3062_v41 }
  0x52   : > { %v3436_v52 = vld [vmem:[%s4146_s1 + $0x18] sm:$0xf0]  ;;  %v3516_v54 = vld [vmem:[#allocation5 + $0xd4] sm:$0xf0]  ;;  %v3127_v57 = vor.u32 %v3550_v48, %v3126_v47  ;;  %v3054_v58 = vld [vmem:[#allocation5 + $0x150] sm:$0xf] }
  0x53   : > { %v3190_v59 = vld [vmem:[#allocation5 + $0x260] sm:$0xf]  ;;  %v3566_v60 = vld [vmem:[#allocation5 + $0x264] sm:$0xf0]  ;;  %v3532_v61 = vld [vmem:[#allocation5 + $0x154] sm:$0xf0]  ;;  %v4176_v62 = vor.u32 %v3436_v52, %v2662_v51  ;;  %v2991_v1 = vor.u32 %v3516_v54, %v2990_v50 }
  0x54   : > { %3635 = vmatpush.bf16.msra.mxu1 %v2919_v11  ;;  %3636 = vmatpush.bf16.msra.mxu2 %v2919_v11  ;;  %v3118_v63 = vld [vmem:[#allocation5 + $0x1d0] sm:$0xf]  ;;  %v3548_v0 = vld [vmem:[#allocation5 + $0x1d4] sm:$0xf0]  ;;  %v2982_v2 = vld [vmem:[#allocation5 + $0xc0] sm:$0xf]  ;;  %v3191_v4 = vor.u32 %v3566_v60, %v3190_v59  ;;  %v3055_v5 = vor.u32 %v3532_v61, %v3054_v58 }
  0x55   : > { %3637 = vmatpush.bf16.msra.mxu3 %v2919_v11  ;;  %1399 = vmatpush.bf16.msra.mxu0 %v2919_v11  ;;  %v3514_v3 = vld [vmem:[#allocation5 + $0xc4] sm:$0xf0]  ;;  %v3119_v6 = vor.u32 %v3548_v0, %v3118_v63  ;;  %v3046_v7 = vld [vmem:[#allocation5 + $0x140] sm:$0xf]  ;;  %v3182_v8 = vld [vmem:[#allocation5 + $0x250] sm:$0xf] }
  0x56   : > { %v3564_v9 = vld [vmem:[#allocation5 + $0x254] sm:$0xf0]  ;;  %v3530_v10 = vld [vmem:[#allocation5 + $0x144] sm:$0xf0]  ;;  %v3110_v11 = vld [vmem:[#allocation5 + $0x1c0] sm:$0xf]  ;;  %v2983_v13 = vor.u32 %v3514_v3, %v2982_v2 }
  0x57   : > { %v3546_v12 = vld [vmem:[#allocation5 + $0x1c4] sm:$0xf0]  ;;  %v3512_v15 = vld [vmem:[#allocation5 + $0xb4] sm:$0xf0]  ;;  %v3183_v16 = vor.u32 %v3564_v9, %v3182_v8  ;;  %v3038_v21 = vld [vmem:[#allocation5 + $0x130] sm:$0xf] }
  0x58   : > { %3638 = vmatpush.bf16.msra.mxu1 %v2911_v14  ;;  %3639 = vmatpush.bf16.msra.mxu2 %v2911_v14  ;;  %v3111_v18 = vor.u32 %v3546_v12, %v3110_v11  ;;  %v2746_v19 = vld [vmem:[%s4146_s1 + $0xa8] sm:$0xf]  ;;  %v3174_v22 = vld [vmem:[#allocation5 + $0x240] sm:$0xf]  ;;  %v3528_v24 = vld [vmem:[#allocation5 + $0x134] sm:$0xf0] }
  0x59   : > { %3640 = vmatpush.bf16.msra.mxu3 %v2911_v14  ;;  %1400 = vmatpush.bf16.msra.mxu0 %v2911_v14  ;;  %v2974_v14 = vld [vmem:[#allocation5 + $0xb0] sm:$0xf]  ;;  %v3562_v23 = vld [vmem:[#allocation5 + $0x244] sm:$0xf0]  ;;  %v3544_v26 = vld [vmem:[#allocation5 + $0x1b4] sm:$0xf0] }
  0x5a   : > { %v3102_v25 = vld [vmem:[#allocation5 + $0x1b0] sm:$0xf]  ;;  %v2802_v27 = vld [vmem:[%s4146_s1 + $0x118] sm:$0xf]  ;;  %v3471_v28 = vld [vmem:[%s4146_s1 + $0x130] sm:$0xf0]  ;;  %v2975_v30 = vor.u32 %v3512_v15, %v2974_v14  ;;  %v3175_v34 = vor.u32 %v3562_v23, %v3174_v22 }
  0x5b   : > { %v2858_v29 = vld [vmem:[%s4146_s1 + $0x188] sm:$0xf]  ;;  %v2966_v32 = vld [vmem:[#allocation5 + $0xa0] sm:$0xf]  ;;  %v3103_v36 = vor.u32 %v3544_v26, %v3102_v25  ;;  %v3166_v38 = vld [vmem:[#allocation5 + $0x230] sm:$0xf]  ;;  %v4188_v41 = vor.u32 %v3471_v28, %v2802_v27 }
  0x5c   : > { %3641 = vmatpush.bf16.msra.mxu1 %v2903_v17  ;;  %3642 = vmatpush.bf16.msra.mxu2 %v2903_v17  ;;  %v3510_v33 = vld [vmem:[#allocation5 + $0xa4] sm:$0xf0]  ;;  %v3030_v37 = vld [vmem:[#allocation5 + $0x120] sm:$0xf]  ;;  %v2690_v48 = vld [vmem:[%s4146_s1 + $0x38] sm:$0xf] }
  0x5d   : > { %3643 = vmatpush.bf16.msra.mxu3 %v2903_v17  ;;  %1401 = vmatpush.bf16.msra.mxu0 %v2903_v17  ;;  %v3047_v17 = vor.u32 %v3530_v10, %v3046_v7  ;;  %v3526_v42 = vld [vmem:[#allocation5 + $0x124] sm:$0xf0]  ;;  %v3094_v43 = vld [vmem:[#allocation5 + $0x1a0] sm:$0xf]  ;;  %v3443_v50 = vld [vmem:[%s4146_s1 + $0x50] sm:$0xf0]  ;;  %v2967_v51 = vor.u32 %v3510_v33, %v2966_v32 }
  0x5e   : > { %v3542_v46 = vld [vmem:[#allocation5 + $0x1a4] sm:$0xf0]  ;;  %v2958_v52 = vld [vmem:[#allocation5 + $0x90] sm:$0xf]  ;;  %v3158_v58 = vld [vmem:[#allocation5 + $0x220] sm:$0xf]  ;;  %v4196_v61 = vor.u32 %v3443_v50, %v2690_v48 }
  0x5f   : > { %v3558_v59 = vld [vmem:[#allocation5 + $0x224] sm:$0xf0]  ;;  %v3524_v60 = vld [vmem:[#allocation5 + $0x114] sm:$0xf0]  ;;  %v3086_v63 = vld [vmem:[#allocation5 + $0x190] sm:$0xf] }
  0x60   : > { %3644 = vmatpush.bf16.msra.mxu1 %v2895_v20  ;;  %3645 = vmatpush.bf16.msra.mxu2 %v2895_v20  ;;  %v3540_v0 = vld [vmem:[#allocation5 + $0x194] sm:$0xf0]  ;;  %v2950_v2 = vld [vmem:[#allocation5 + $0x80] sm:$0xf]  ;;  %v3506_v3 = vld [vmem:[#allocation5 + $0x84] sm:$0xf0] }
  0x61   : > { %3646 = vmatpush.bf16.msra.mxu3 %v2895_v20  ;;  %1402 = vmatpush.bf16.msra.mxu0 %v2895_v20  ;;  %v3457_v20 = vld [vmem:[%s4146_s1 + $0xc0] sm:$0xf0]  ;;  %v3014_v7 = vld [vmem:[#allocation5 + $0x100] sm:$0xf]  ;;  %v3150_v8 = vld [vmem:[#allocation5 + $0x210] sm:$0xf]  ;;  %v2951_v15 = vor.u32 %v3506_v3, %v2950_v2 }
  0x62   : > { %v3556_v9 = vld [vmem:[#allocation5 + $0x214] sm:$0xf0]  ;;  %v3522_v10 = vld [vmem:[#allocation5 + $0x104] sm:$0xf0]  ;;  %v3078_v11 = vld [vmem:[#allocation5 + $0x180] sm:$0xf] }
  0x63   : > { %v3538_v12 = vld [vmem:[#allocation5 + $0x184] sm:$0xf0]  ;;  %v3584_v14 = vld [vmem:[#allocation5 + $0x2f4] sm:$0xf0]  ;;  %v2664_v22 = vld [vmem:[%s4146_s1 + $0x1c] sm:$0xf0] }
  0x64   : > { %3647 = vmatpush.bf16.msra.mxu1 %v2887_v31  ;;  %3648 = vmatpush.bf16.msra.mxu2 %v2887_v31  ;;  %v3437_v25 = vld [vmem:[%s4146_s1 + $0x20] sm:$0xf0]  ;;  %v3434_v26 = vld [vmem:[%s4146_s1 + $0xc] sm:$0xf]  ;;  %v2672_v27 = vld [vmem:[%s4146_s1 + $0x24] sm:$0xf0] }
  0x65   : > { %3649 = vmatpush.bf16.msra.mxu3 %v2887_v31  ;;  %1403 = vmatpush.bf16.msra.mxu0 %v2887_v31  ;;  %v3485_v31 = vld [vmem:[%s4146_s1 + $0x1a0] sm:$0xf0]  ;;  %v4210_v33 = vor.u32 %v3434_v26, %v2672_v27  ;;  %v2698_v48 = vld [vmem:[%s4146_s1 + $0x40] sm:$0xf]  ;;  %v3444_v50 = vld [vmem:[%s4146_s1 + $0x58] sm:$0xf0] }
  0x66   : > { %v4190_v47 = vor.u32 %v3485_v31, %v2858_v29  ;;  %v3254_v29 = vld [vmem:[#allocation5 + $0x2e0] sm:$0xf]  ;;  %v2726_v2 = vld [vmem:[%s4146_s1 + $0x78] sm:$0xf]  ;;  %v3451_v3 = vld [vmem:[%s4146_s1 + $0x90] sm:$0xf0] }
  0x67   : > { %1414 = vmatmul.bf16.vlgmr.msra.gmra.mxu1 %v4166_v44  ;;  %1424 = vmatmul.bf16.vlgmr.msra.gmra.mxu2 %v4168_v45  ;;  %v3222_v27 = vld [vmem:[#allocation5 + $0x2a0] sm:$0xf]  ;;  %s2659_s29 = sshll.u32 %s4142_s2, 7  ;;  %s3625_s22 = sshll.u32 %s4049_s28, 7 }
  0x68   : > { %1445 = vmatpush.bf16.msrb.mxu1 %v3007_v35  ;;  %1494 = vmatpush.bf16.msrb.mxu2 %v3071_v39  ;;  %v3039_v35 = vor.u32 %v3528_v24, %v3038_v21  ;;  %v3560_v39 = vld [vmem:[#allocation5 + $0x234] sm:$0xf0]  ;;  %v3433_v21 = vld [vmem:[%s4146_s1 + $0x4] sm:$0xf]  ;;  %v2670_v24 = vld [vmem:[%s4146_s1 + $0x8] sm:$0xf]  ;;  %s2529_s16 = scalar_lea.hbm %s4845_s7, %s3625_s22 }
  0x69   : > { %1543 = vmatpush.bf16.msrb.mxu3 %v3135_v40  ;;  %1592 = vmatpush.bf16.msrb.mxu0 %v3199_v55  ;;  %v4186_v40 = vor.u32 %v3457_v20, %v2746_v19  ;;  %v3167_v54 = vor.u32 %v3560_v39, %v3166_v38  ;;  %v3031_v55 = vor.u32 %v3526_v42, %v3030_v37  ;;  %v3142_v19 = vld [vmem:[#allocation5 + $0x200] sm:$0xf]  ;;  %v3554_v20 = vld [vmem:[#allocation5 + $0x204] sm:$0xf0]  ;;  %v3246_v38 = vld [vmem:[#allocation5 + $0x2d0] sm:$0xf] }
  0x6a   : > { %1434 = vmatmul.bf16.vlgmr.msra.gmra.mxu3 %v4170_v49  ;;  %1404 = vmatmul.bf16.vlgmr.msra.gmra.mxu0 %v4176_v62  ;;  %v3143_v28 = vor.u32 %v3554_v20, %v3142_v19  ;;  %v4206_v31 = vor.u32 %v3433_v21, %v2664_v22  ;;  %v4208_v32 = vor.u32 %v3437_v25, %v2670_v24  ;;  %v3580_v39 = vld [vmem:[#allocation5 + $0x2d4] sm:$0xf0]  ;;  %v3455_v19 = vld [vmem:[%s4146_s1 + $0xb4] sm:$0xf]  ;;  %v2756_v20 = vld [vmem:[%s4146_s1 + $0xcc] sm:$0xf0] }
  0x6b   : > { %v3247_v42 = vor.u32 %v3580_v39, %v3246_v38  ;;  %v2762_v24 = vld [vmem:[%s4146_s1 + $0xb8] sm:$0xf]  ;;  %v3459_v25 = vld [vmem:[%s4146_s1 + $0xd0] sm:$0xf0]  ;;  %v3462_v38 = vld [vmem:[%s4146_s1 + $0xec] sm:$0xf] }
  0x6c   : > { %1446 = vmatpush.bf16.msrb.mxu1 %v2999_v53  ;;  %1495 = vmatpush.bf16.msrb.mxu2 %v3063_v56  ;;  %v3508_v53 = vld [vmem:[#allocation5 + $0x94] sm:$0xf0]  ;;  %v3095_v56 = vor.u32 %v3542_v46, %v3094_v43  ;;  %v3440_v43 = vld [vmem:[%s4146_s1 + $0x3c] sm:$0xf]  ;;  %v4276_v26 = vor.u32 %v3459_v25, %v2762_v24  ;;  %v2784_v39 = vld [vmem:[%s4146_s1 + $0x104] sm:$0xf0] }
  0x6d   : > { %1544 = vmatpush.bf16.msrb.mxu3 %v3127_v57  ;;  %1593 = vmatpush.bf16.msrb.mxu0 %v3191_v4  ;;  %v3022_v57 = vld [vmem:[#allocation5 + $0x110] sm:$0xf]  ;;  %v3159_v4 = vor.u32 %v3558_v59, %v3158_v58  ;;  %v2692_v46 = vld [vmem:[%s4146_s1 + $0x54] sm:$0xf0]  ;;  %v3238_v59 = vld [vmem:[#allocation5 + $0x2c0] sm:$0xf] }
  0x6e   : > { %v3519_v24 = vld [vmem:[#allocation5 + $0xf4] sm:$0xf]  ;;  %v3472_v25 = vld [vmem:[%s4146_s1 + $0x138] sm:$0xf0]  ;;  %s4786_s20 = scalar_lea.vmem [#allocation11], %s2659_s29  ;;  %s2532_s11 = sshll.u32 %s2529_s16, 4  ;;  %s2533_s11 = int_to_ptr.hbm [resolvable:$true] %s2532_s11 }
  0x6f   : > { %s2530_s23 = sshll.u32 %s4786_s20, 4  ;;  %s2518_s15 = scalar_lea.sflag [#allocation4], %s4142_s2  ;;  %s2531_s23 = int_to_ptr.vmem [resolvable:$true] %s2530_s23 }
  0x70   : > { %1447 = vmatpush.bf16.msrb.mxu1 %v2991_v1  ;;  %1496 = vmatpush.bf16.msrb.mxu2 %v3055_v5  ;;  %v2959_v1 = vor.u32 %v3508_v53, %v2958_v52  ;;  %v3023_v5 = vor.u32 %v3524_v60, %v3022_v57  ;;  %v2700_v52 = vld [vmem:[%s4146_s1 + $0x5c] sm:$0xf0]  ;;  %v4226_v53 = vor.u32 %v3440_v43, %v2692_v46  ;;  %v3445_v57 = vld [vmem:[%s4146_s1 + $0x60] sm:$0xf0]  ;;  %v3578_v60 = vld [vmem:[#allocation5 + $0x2c4] sm:$0xf0] }
  0x71   : > { %1545 = vmatpush.bf16.msrb.mxu3 %v3119_v6  ;;  %1594 = vmatpush.bf16.msrb.mxu0 %v3183_v16  ;;  %v3087_v6 = vor.u32 %v3540_v0, %v3086_v63  ;;  %v3151_v16 = vor.u32 %v3556_v9, %v3150_v8  ;;  %v3239_v63 = vor.u32 %v3578_v60, %v3238_v59  ;;  %v3447_v0 = vld [vmem:[%s4146_s1 + $0x74] sm:$0xf]  ;;  %v2734_v9 = vld [vmem:[%s4146_s1 + $0x80] sm:$0xf]  ;;  %v3214_v59 = vld [vmem:[#allocation5 + $0x290] sm:$0xf] }
  0x72   : > { %v4290_v46 = vor.u32 %v3462_v38, %v2784_v39  ;;  %v3572_v60 = vld [vmem:[#allocation5 + $0x294] sm:$0xf0]  ;;  %s3914_s3 = sshra.s32 %s2533_s11, 4  ;;  %s3920_s30 = scalar_lea.hbm %s4845_s7, 256  ;;  %s3915_s3 = int_to_ptr.hbm [resolvable:$true] %s3914_s3 }
  0x73   : > { %s3916_s17 = scalar_lea.hbm %s3915_s3, 128  ;;  %p3921_p11 = scmp.lt.s32.totalorder %s3915_s3, %s4845_s7 }
  0x74   : > { %1448 = vmatpush.bf16.msrb.mxu1 %v2983_v13  ;;  %1497 = vmatpush.bf16.msrb.mxu2 %v3047_v17  ;;  %v3262_v13 = vld [vmem:[#allocation5 + $0x2f0] sm:$0xf]  ;;  %v3015_v17 = vor.u32 %v3522_v10, %v3014_v7  ;;  %v4248_v7 = vor.u32 %v3451_v3, %v2726_v2  ;;  %v3452_v10 = vld [vmem:[%s4146_s1 + $0x98] sm:$0xf0]  ;;  %4878 = vst [vmem:[#allocation17_spill] sm:$0xff] %v4290_v46  ;;  %p3917_p1 = scmp.ne.s32.totalorder %s3915_s3, %s3916_s17  ;;  %p3922_p9 = scmp.lt.s32.totalorder %s3920_s30, %s3916_s17 }
  0x75   : > { %1546 = vmatpush.bf16.msrb.mxu3 %v3111_v18  ;;  %1595 = vmatpush.bf16.msrb.mxu0 %v3175_v34  ;;  %v3079_v18 = vor.u32 %v3538_v12, %v3078_v11  ;;  %v3263_v23 = vor.u32 %v3584_v14, %v3262_v13  ;;  %v2678_v34 = vld [vmem:[%s4146_s1 + $0x10] sm:$0xf]  ;;  %v4256_v11 = vor.u32 %v3452_v10, %v2734_v9  ;;  %v3576_v13 = vld [vmem:[#allocation5 + $0x2b4] sm:$0xf0]  ;;  %v3318_v3 = vld [vmem:[#allocation5 + $0x360] sm:$0xf] }
  0x76   : > { %v3230_v12 = vld [vmem:[#allocation5 + $0x2b0] sm:$0xf]  ;;  %v3501_v9 = vld [vmem:[#allocation5 + $0x64] sm:$0xf]  ;;  %v2936_v10 = vld [vmem:[#allocation5 + $0x68] sm:$0xf0]  ;;  %p3918_p4 = pnand %p3917_p1, %p4112_p3  ;;  %p3923_p2 = por %p3922_p9, %p3921_p11 }
  0x77   : > { %1419 = vmatmul.bf16.gmra.mxu1 %v4186_v40  ;;  %1429 = vmatmul.bf16.gmra.mxu2 %v4188_v41  ;;  %v3231_v14 = vor.u32 %v3576_v13, %v3230_v12  ;;  %v2939_v12 = vor.u32 %v3501_v9, %v2936_v10  ;;  %v3310_v13 = vld [vmem:[#allocation5 + $0x350] sm:$0xf]  ;;  %v3570_v9 = vld [vmem:[#allocation5 + $0x284] sm:$0xf0] }
  0x78   : > { %1449 = vmatpush.bf16.msrb.mxu1 %v2975_v30  ;;  %1498 = vmatpush.bf16.msrb.mxu2 %v3039_v35  ;;  %v3582_v30 = vld [vmem:[#allocation5 + $0x2e4] sm:$0xf0]  ;;  %v3438_v35 = vld [vmem:[%s4146_s1 + $0x28] sm:$0xf0]  ;;  %p3919_p8 = pneg %p3918_p4 }
  0x79   : > { %1547 = vmatpush.bf16.msrb.mxu3 %v3103_v36  ;;  %1596 = vmatpush.bf16.msrb.mxu0 %v3167_v54  ;;  %v3255_v36 = vor.u32 %v3582_v30, %v3254_v29  ;;  %v4216_v37 = vor.u32 %v3438_v35, %v2678_v34  ;;  %v4228_v54 = vor.u32 %v3444_v50, %v2698_v48  ;;  %v3461_v30 = vld [vmem:[%s4146_s1 + $0xe4] sm:$0xf]  ;;  %v2776_v34 = vld [vmem:[%s4146_s1 + $0xfc] sm:$0xf0]  ;;  %v2782_v35 = vld [vmem:[%s4146_s1 + $0xe8] sm:$0xf] }
  0x7a   : > { %1439 = vmatmul.bf16.gmra.mxu3 %v4190_v47  ;;  %1409 = vmatmul.bf16.gmra.mxu0 %v4196_v61  ;;  %v2790_v48 = vld [vmem:[%s4146_s1 + $0xf0] sm:$0xf]  ;;  %v3466_v50 = vld [vmem:[%s4146_s1 + $0x108] sm:$0xf0]  ;;  %p3924_p10 = pnand %p3923_p2, %p3919_p8 }
  0x7c   : > { %1450 = vmatpush.bf16.msrb.mxu1 %v2967_v51  ;;  %1499 = vmatpush.bf16.msrb.mxu2 %v3031_v55  ;;  %v3441_v51 = vld [vmem:[%s4146_s1 + $0x44] sm:$0xf] }
  0x7d   : > { %1548 = vmatpush.bf16.msrb.mxu3 %v3095_v56  ;;  %1597 = vmatpush.bf16.msrb.mxu0 %v3159_v4  ;;  %v4230_v55 = vor.u32 %v3441_v51, %v2700_v52  ;;  %v2706_v56 = vld [vmem:[%s4146_s1 + $0x48] sm:$0xf]  ;;  %v3448_v4 = vld [vmem:[%s4146_s1 + $0x7c] sm:$0xf]  ;;  %v3326_v51 = vld [vmem:[#allocation5 + $0x370] sm:$0xf] }
  0x7e   : > { %v4236_v58 = vor.u32 %v3445_v57, %v2706_v56  ;;  %v3600_v52 = vld [vmem:[#allocation5 + $0x374] sm:$0xf0]  ;;  %v4296_v57 = vor.u32 %v3466_v50, %v2790_v48  ;;  %v3497_v50 = vld [vmem:[#allocation5 + $0x44] sm:$0xf] }
  0x7f   : > { %v3327_v56 = vor.u32 %v3600_v52, %v3326_v51  ;;  %v2920_v51 = vld [vmem:[#allocation5 + $0x48] sm:$0xf0]  ;;  %v3517_v52 = vld [vmem:[#allocation5 + $0xe4] sm:$0xf] }
  0x80   : > { %1451 = vmatpush.bf16.msrb.mxu1 %v2959_v1  ;;  %1500 = vmatpush.bf16.msrb.mxu2 %v3023_v5  ;;  %v2720_v1 = vld [vmem:[%s4146_s1 + $0x8c] sm:$0xf0]  ;;  %v2728_v5 = vld [vmem:[%s4146_s1 + $0x94] sm:$0xf0]  ;;  %4879 = vst [vmem:[#allocation18_spill] sm:$0xff] %v4296_v57 }
  0x81   : > { %1549 = vmatpush.bf16.msrb.mxu3 %v3087_v6  ;;  %1598 = vmatpush.bf16.msrb.mxu0 %v3151_v16  ;;  %v4246_v6 = vor.u32 %v3447_v0, %v2720_v1  ;;  %v4250_v8 = vor.u32 %v3448_v4, %v2728_v5  ;;  %v2748_v16 = vld [vmem:[%s4146_s1 + $0xc4] sm:$0xf0]  ;;  %v3215_v0 = vor.u32 %v3572_v60, %v3214_v59  ;;  %v2944_v1 = vld [vmem:[#allocation5 + $0x78] sm:$0xf0]  ;;  %v3473_v60 = vld [vmem:[%s4146_s1 + $0x140] sm:$0xf0] }
  0x82   : > { %v3598_v4 = vld [vmem:[#allocation5 + $0x364] sm:$0xf0] }
  0x83   : > { %v3319_v5 = vor.u32 %v3598_v4, %v3318_v3  ;;  %v2818_v59 = vld [vmem:[%s4146_s1 + $0x128] sm:$0xf]  ;;  %v3592_v3 = vld [vmem:[#allocation5 + $0x334] sm:$0xf0] }
  0x84   : > { %1452 = vmatpush.bf16.msrb.mxu1 %v2951_v15  ;;  %1501 = vmatpush.bf16.msrb.mxu2 %v3015_v17  ;;  %v3454_v15 = vld [vmem:[%s4146_s1 + $0xac] sm:$0xf]  ;;  %v2754_v17 = vld [vmem:[%s4146_s1 + $0xb0] sm:$0xf]  ;;  %v4316_v4 = vor.u32 %v3473_v60, %v2818_v59  ;;  %v3491_v59 = vld [vmem:[#allocation5 + $0x14] sm:$0xf] }
  0x85   : > { %1550 = vmatpush.bf16.msrb.mxu3 %v3079_v18  ;;  %1599 = vmatpush.bf16.msrb.mxu0 %v3143_v28  ;;  %v3458_v18 = vld [vmem:[%s4146_s1 + $0xc8] sm:$0xf0]  ;;  %v4266_v21 = vor.u32 %v3454_v15, %v2748_v16  ;;  %v3574_v28 = vld [vmem:[#allocation5 + $0x2a4] sm:$0xf0]  ;;  %v3468_v15 = vld [vmem:[%s4146_s1 + $0x11c] sm:$0xf] }
  0x86   : > { %v4268_v22 = vor.u32 %v3458_v18, %v2754_v17  ;;  %v3223_v29 = vor.u32 %v3574_v28, %v3222_v27  ;;  %v2804_v16 = vld [vmem:[%s4146_s1 + $0x134] sm:$0xf0]  ;;  %v2810_v17 = vld [vmem:[%s4146_s1 + $0x120] sm:$0xf]  ;;  %v3469_v27 = vld [vmem:[%s4146_s1 + $0x124] sm:$0xf] }
  0x87   : > { %1453 = vmatmul.bf16.vlgmr.msrb.gmra.mxu1 %v4206_v31  ;;  %1502 = vmatmul.bf16.vlgmr.msrb.gmra.mxu2 %v4208_v32  ;;  %v4306_v39 = vor.u32 %v3468_v15, %v2804_v16  ;;  %v4308_v48 = vor.u32 %v3472_v25, %v2810_v17  ;;  %4882 = vst [vmem:[#allocation21_spill] sm:$0xff] %v4316_v4  ;;  %v3515_v15 = vld [vmem:[#allocation5 + $0xd4] sm:$0xf]  ;;  %v2992_v16 = vld [vmem:[#allocation5 + $0xd8] sm:$0xf0] }
  0x88   : > { %1641 = vmatpush.bf16.msra.mxu1 %v3263_v23  ;;  %v4270_v23 = vor.u32 %v3455_v19, %v2756_v20  ;;  %1690 = vmatpush.bf16.msra.mxu2 %v3327_v56  ;;  %v3499_v19 = vld [vmem:[#allocation5 + $0x54] sm:$0xf]  ;;  %v2928_v20 = vld [vmem:[#allocation5 + $0x58] sm:$0xf0]  ;;  %v3493_v25 = vld [vmem:[#allocation5 + $0x24] sm:$0xf] }
  0x89   : > { %v2931_v28 = vor.u32 %v3499_v19, %v2928_v20  ;;  %4880 = vst [vmem:[#allocation19_spill] sm:$0xff] %v4308_v48  ;;  %v3286_v19 = vld [vmem:[#allocation5 + $0x320] sm:$0xf]  ;;  %v3590_v20 = vld [vmem:[#allocation5 + $0x324] sm:$0xf0] }
  0x8a   : > { %1551 = vmatmul.bf16.vlgmr.msrb.gmra.mxu3 %v4210_v33  ;;  %1600 = vmatmul.bf16.vlgmr.msrb.gmra.mxu0 %v4216_v37  ;;  %v2896_v60 = vld [vmem:[#allocation5 + $0x18] sm:$0xf0] }
  0x8c   : > { %1642 = vmatpush.bf16.msra.mxu1 %v3255_v36  ;;  %v3465_v36 = vld [vmem:[%s4146_s1 + $0x100] sm:$0xf0]  ;;  %1691 = vmatpush.bf16.msra.mxu2 %v3319_v5  ;;  %v3206_v5 = vld [vmem:[#allocation5 + $0x280] sm:$0xf] }
  0x8d   : > { %v4288_v43 = vor.u32 %v3465_v36, %v2782_v35  ;;  %v3302_v35 = vld [vmem:[#allocation5 + $0x340] sm:$0xf]  ;;  %v3594_v36 = vld [vmem:[#allocation5 + $0x344] sm:$0xf0] }
  0x8e   : > { %v3303_v38 = vor.u32 %v3594_v36, %v3302_v35  ;;  %v3278_v35 = vld [vmem:[#allocation5 + $0x310] sm:$0xf]  ;;  %v3588_v36 = vld [vmem:[#allocation5 + $0x314] sm:$0xf0] }
  0x8f   : > { %4877 = vst [vmem:[#allocation16_spill] sm:$0xff] %v4288_v43 }
  0x90   : > { %1643 = vmatpush.bf16.msra.mxu1 %v3247_v42  ;;  %v4286_v42 = vor.u32 %v3461_v30, %v2776_v34  ;;  %v2812_v30 = vld [vmem:[%s4146_s1 + $0x13c] sm:$0xf0] }
  0x91   : > { %v4310_v56 = vor.u32 %v3469_v27, %v2812_v30  ;;  %v2904_v27 = vld [vmem:[#allocation5 + $0x28] sm:$0xf0] }
  0x92   : > { %v2907_v30 = vor.u32 %v3493_v25, %v2904_v27  ;;  %v3480_v25 = vld [vmem:[%s4146_s1 + $0x178] sm:$0xf0]  ;;  %v2968_v27 = vld [vmem:[#allocation5 + $0xa8] sm:$0xf0] }
  0x93   : > { %4881 = vst [vmem:[#allocation20_spill] sm:$0xff] %v4310_v56 }
  0x94   : > { %1644 = vmatpush.bf16.msra.mxu1 %v3239_v63  ;;  %v3503_v63 = vld [vmem:[#allocation5 + $0x74] sm:$0xf] }
  0x95   : > { %v2947_v2 = vor.u32 %v3503_v63, %v2944_v1  ;;  %v3000_v63 = vld [vmem:[#allocation5 + $0xe8] sm:$0xf0] }
  0x96   : > { %v3003_v1 = vor.u32 %v3517_v52, %v3000_v63  ;;  %v3279_v52 = vor.u32 %v3588_v36, %v3278_v35  ;;  %v3511_v63 = vld [vmem:[#allocation5 + $0xb4] sm:$0xf]  ;;  %v3072_v36 = vld [vmem:[#allocation5 + $0x178] sm:$0xf0] }
  0x97   : > { %1458 = vmatmul.bf16.gmra.mxu1 %v4226_v53  ;;  %1507 = vmatmul.bf16.gmra.mxu2 %v4228_v54  ;;  %v3535_v35 = vld [vmem:[#allocation5 + $0x174] sm:$0xf] }
  0x98   : > { %1645 = vmatpush.bf16.msra.mxu1 %v3231_v14  ;;  %1739 = vmatpush.bf16.msra.mxu3 %v2947_v2  ;;  %v3596_v14 = vld [vmem:[#allocation5 + $0x354] sm:$0xf0]  ;;  %v3294_v2 = vld [vmem:[#allocation5 + $0x330] sm:$0xf] }
  0x99   : > { %v3311_v18 = vor.u32 %v3596_v14, %v3310_v13  ;;  %v3295_v10 = vor.u32 %v3592_v3, %v3294_v2  ;;  %v3207_v13 = vor.u32 %v3570_v9, %v3206_v5  ;;  %v2912_v14 = vld [vmem:[#allocation5 + $0x38] sm:$0xf0]  ;;  %v2840_v3 = vld [vmem:[%s4146_s1 + $0x174] sm:$0xf0]  ;;  %v2899_v5 = vor.u32 %v3491_v59, %v2896_v60 }
  0x9a   : > { %1556 = vmatmul.bf16.gmra.mxu3 %v4230_v55  ;;  %1605 = vmatmul.bf16.gmra.mxu0 %v4236_v58  ;;  %v2976_v2 = vld [vmem:[#allocation5 + $0xb8] sm:$0xf0] }
  0x9b   : > { %1692 = vmatpush.bf16.msra.mxu2 %v3311_v18  ;;  %v2995_v18 = vor.u32 %v3515_v15, %v2992_v16  ;;  %v2979_v9 = vor.u32 %v3511_v63, %v2976_v2  ;;  %v3489_v16 = vld [vmem:[#allocation5 + $0x4] sm:$0xf] }
  0x9c   : > { %1646 = vmatpush.bf16.msra.mxu1 %v3223_v29  ;;  %1740 = vmatpush.bf16.msra.mxu3 %v2939_v12  ;;  %v3008_v29 = vld [vmem:[#allocation5 + $0xf8] sm:$0xf0]  ;;  %v3495_v12 = vld [vmem:[#allocation5 + $0x34] sm:$0xf]  ;;  %v3505_v2 = vld [vmem:[#allocation5 + $0x84] sm:$0xf] }
  0x9d   : > { %v3011_v34 = vor.u32 %v3519_v24, %v3008_v29  ;;  %v2915_v17 = vor.u32 %v3495_v12, %v2912_v14  ;;  %v3287_v24 = vor.u32 %v3590_v20, %v3286_v19  ;;  %v2984_v29 = vld [vmem:[#allocation5 + $0xc8] sm:$0xf0]  ;;  %v3586_v12 = vld [vmem:[#allocation5 + $0x304] sm:$0xf0] }
  0x9f   : > { %1788 = vmatpush.bf16.msra.mxu0 %v3011_v34  ;;  %1693 = vmatpush.bf16.msra.mxu2 %v3303_v38  ;;  %v3475_v38 = vld [vmem:[%s4146_s1 + $0x154] sm:$0xf] }
  0xa0   : > { %1647 = vmatpush.bf16.msra.mxu1 %v3215_v0  ;;  %1741 = vmatpush.bf16.msra.mxu3 %v2931_v28  ;;  %v2923_v0 = vor.u32 %v3497_v50, %v2920_v51  ;;  %v3513_v28 = vld [vmem:[#allocation5 + $0xc4] sm:$0xf]  ;;  %v2832_v50 = vld [vmem:[%s4146_s1 + $0x16c] sm:$0xf0]  ;;  %v2838_v51 = vld [vmem:[%s4146_s1 + $0x158] sm:$0xf] }
  0xa1   : > { %v2987_v34 = vor.u32 %v3513_v28, %v2984_v29  ;;  %v4326_v14 = vor.u32 %v3475_v38, %v2832_v50  ;;  %v3507_v38 = vld [vmem:[#allocation5 + $0x94] sm:$0xf] }
  0xa3   : > { %1789 = vmatpush.bf16.msra.mxu0 %v3003_v1  ;;  %1694 = vmatpush.bf16.msra.mxu2 %v3295_v10  ;;  %v3476_v1 = vld [vmem:[%s4146_s1 + $0x15c] sm:$0xf]  ;;  %v3270_v10 = vld [vmem:[#allocation5 + $0x300] sm:$0xf] }
  0xa4   : > { %1742 = vmatpush.bf16.msra.mxu3 %v2923_v0  ;;  %1648 = vmatpush.bf16.msra.mxu1 %v3207_v13  ;;  %v3479_v0 = vld [vmem:[%s4146_s1 + $0x170] sm:$0xf0]  ;;  %v3271_v13 = vor.u32 %v3586_v12, %v3270_v10  ;;  %v4332_v20 = vor.u32 %v3476_v1, %v2840_v3  ;;  %v2952_v3 = vld [vmem:[#allocation5 + $0x88] sm:$0xf0] }
  0xa5   : > { %v4328_v15 = vor.u32 %v3479_v0, %v2838_v51  ;;  %v3075_v51 = vor.u32 %v3535_v35, %v3072_v36  ;;  %v2955_v10 = vor.u32 %v3505_v2, %v2952_v3  ;;  %v3482_v12 = vld [vmem:[%s4146_s1 + $0x18c] sm:$0xf]  ;;  %v3533_v2 = vld [vmem:[#allocation5 + $0x164] sm:$0xf] }
  0xa6   : > { %4884 = vst [vmem:[#allocation23_spill] sm:$0xff] %v4332_v20  ;;  %v3064_v3 = vld [vmem:[#allocation5 + $0x168] sm:$0xf0] }
  0xa7   : > { %1463 = vmatmul.bf16.gmra.mxu1 %v4246_v6  ;;  %1512 = vmatmul.bf16.gmra.mxu2 %v4248_v7  ;;  %4883 = vst [vmem:[#allocation22_spill] sm:$0xff] %v4328_v15 }
  0xa8   : > { %1790 = vmatpush.bf16.msra.mxu0 %v2995_v18  ;;  %1743 = vmatpush.bf16.msra.mxu3 %v2915_v17  ;;  %v2888_v17 = vld [vmem:[#allocation5 + $0x8] sm:$0xf0]  ;;  %v3509_v18 = vld [vmem:[#allocation5 + $0xa4] sm:$0xf] }
  0xa9   : > { %1695 = vmatpush.bf16.msra.mxu2 %v3287_v24  ;;  %v2846_v24 = vld [vmem:[%s4146_s1 + $0x160] sm:$0xf]  ;;  %v2891_v28 = vor.u32 %v3489_v16, %v2888_v17  ;;  %v2971_v29 = vor.u32 %v3509_v18, %v2968_v27  ;;  %1837 = vmatpush.bf16.msrb.mxu1 %v3075_v51  ;;  %v2860_v16 = vld [vmem:[%s4146_s1 + $0x1a4] sm:$0xf0]  ;;  %v2866_v17 = vld [vmem:[%s4146_s1 + $0x190] sm:$0xf] }
  0xaa   : > { %1561 = vmatmul.bf16.gmra.mxu3 %v4250_v8  ;;  %1610 = vmatmul.bf16.gmra.mxu0 %v4256_v11  ;;  %v3486_v18 = vld [vmem:[%s4146_s1 + $0x1a8] sm:$0xf0]  ;;  %v4364_v35 = vor.u32 %v3482_v12, %v2860_v16  ;;  %v3067_v12 = vor.u32 %v3533_v2, %v3064_v3 }
  0xab   : > { %v4366_v36 = vor.u32 %v3486_v18, %v2866_v17 }
  0xac   : > { %1791 = vmatpush.bf16.msra.mxu0 %v2987_v34  ;;  %1744 = vmatpush.bf16.msra.mxu3 %v2907_v30  ;;  %v4336_v30 = vld [vmem:[#allocation7] sm:$0x3]  ;;  %v4340_v34 = vor.u32 %v3480_v25, %v2846_v24  ;;  %v3483_v24 = vld [vmem:[%s4146_s1 + $0x194] sm:$0xf]  ;;  %v2868_v25 = vld [vmem:[%s4146_s1 + $0x1ac] sm:$0xf0] }
  0xad   : > { %1696 = vmatpush.bf16.msra.mxu2 %v3279_v52  ;;  %v2960_v52 = vld [vmem:[#allocation5 + $0x98] sm:$0xf0]  ;;  %v4344_v59 = vperm.slane %v4336_v30, 0  ;;  %4886 = vst [vmem:[#allocation25_spill] sm:$0xff] %v4366_v36  ;;  %1838 = vmatpush.bf16.msrb.mxu1 %v3067_v12 }
  0xae   : > { %4885 = vst [vmem:[#allocation24_spill] sm:$0xff] %v4340_v34  ;;  %v2963_v60 = vor.u32 %v3507_v38, %v2960_v52  ;;  %v4373_v52 = vor.u32 %v3483_v24, %v2868_v25 }
  0xb0   : > { %1792 = vmatpush.bf16.msra.mxu0 %v2979_v9  ;;  %1745 = vmatpush.bf16.msra.mxu3 %v2899_v5  ;;  %4887 = vst [vmem:[#allocation26_spill] sm:$0xff] %v4373_v52 }
  0xb1   : > { %1697 = vmatpush.bf16.msra.mxu2 %v3271_v13 }
  0xb4   : > { %1793 = vmatpush.bf16.msra.mxu0 %v2971_v29  ;;  %1746 = vmatpush.bf16.msra.mxu3 %v2891_v28 }
  0xb7   : > { %1468 = vmatmul.bf16.gmra.mxu1 %v4266_v21  ;;  %1517 = vmatmul.bf16.gmra.mxu2 %v4268_v22 }
  0xb8   : > { %1794 = vmatpush.bf16.msra.mxu0 %v2963_v60  ;;  %v2874_v60 = vld [vmem:[%s4146_s1 + $0x198] sm:$0xf] }
  0xba   : > { %1566 = vmatmul.bf16.gmra.mxu3 %v4270_v23  ;;  %1615 = vmatmul.bf16.gmra.mxu0 %v4276_v26 }
  0xbc   : > { %1795 = vmatpush.bf16.msra.mxu0 %v2955_v10 }
  0xc7   : > { %1473 = vmatmul.bf16.gmra.mxu1 %v4286_v42  ;;  %1522 = vmatmul.bf16.gmra.mxu2 %v4288_v43 }
  0xca   : > { %1571 = vmatmul.bf16.gmra.mxu3 %v4290_v46  ;;  %1620 = vmatmul.bf16.gmra.mxu0 %v4296_v57  ;;  %v2714_v57 = vld [vmem:[%s4146_s1 + $0x50] sm:$0xf]  ;;  %v3446_v46 = vld [vmem:[%s4146_s1 + $0x68] sm:$0xf0] }
  0xd7   : > { %1478 = vmatmul.bf16.gmra.mxu1 %v4306_v39  ;;  %1527 = vmatmul.bf16.gmra.mxu2 %v4308_v48 }
  0xda   : > { %1576 = vmatmul.bf16.gmra.mxu3 %v4310_v56  ;;  %1625 = vmatmul.bf16.gmra.mxu0 %v4316_v4  ;;  %v3442_v56 = vld [vmem:[%s4146_s1 + $0x4c] sm:$0xf] }
  0xe4   : > { %v4330_v19 = vpop.f32.mrf.mxu1 }
  0xe7   : > { %1483 = vmatmul.bf16.gmra.mxu1 %v4326_v14  ;;  %1532 = vmatmul.bf16.gmra.mxu2 %v4328_v15  ;;  %v1405_v50 = vpop.f32.mrf.mxu0  ;;  %v3056_v15 = vld [vmem:[#allocation5 + $0x158] sm:$0xf0] }
  0xe8   : > { %v1406_v2 = vadd.f32 %v1405_v50, %v4344_v59  ;;  %v3531_v50 = vld [vmem:[#allocation5 + $0x154] sm:$0xf] }
  0xea   : > { %1581 = vmatmul.bf16.gmra.mxu3 %v4332_v20  ;;  %v1425_v63 = vpop.f32.mrf.mxu2  ;;  %1630 = vmatmul.bf16.gmra.mxu0 %v4340_v34 }
  0xeb   : > { %v4347_v0 = vadd.f32 %v1425_v63, %v4344_v59  ;;  %v3487_v63 = vld [vmem:[%s4146_s1 + $0x1b0] sm:$0xf0] }
  0xec   : > { %v4350_v5 = vpop.f32.mrf.mxu1 }
  0xed   : > { %v1435_v1 = vpop.f32.mrf.mxu3 }
  0xee   : > { %v4353_v9 = vadd.f32 %v1435_v1, %v4344_v59  ;;  %v4379_v1 = vor.u32 %v3487_v63, %v2874_v60  ;;  %v2680_v60 = vld [vmem:[%s4146_s1 + $0x2c] sm:$0xf0]  ;;  %v2686_v63 = vld [vmem:[%s4146_s1 + $0x18] sm:$0xf] }
  0xef   : > { %v1407_v13 = vpop.f32.mrf.mxu0 }
  0xf0   : > { %4888 = vst [vmem:[#allocation27_spill] sm:$0xff] %v4379_v1 }
  0xf2   : > { %v1427_v27 = vpop.f32.mrf.mxu2 }
  0xf3   : > { %v4362_v28 = vadd.f32 %v1427_v27, %v4344_v59  ;;  %v3435_v27 = vld [vmem:[%s4146_s1 + $0x14] sm:$0xf] }
  0xf4   : > { %v4368_v38 = vpop.f32.mrf.mxu1 }
  0xf5   : > { %v1437_v29 = vpop.f32.mrf.mxu3 }
  0xf6   : > { %v4371_v51 = vadd.f32 %v1437_v29, %v4344_v59 }
  0xf7   : > { %1488 = vmatmul.bf16.gmra.mxu1 %v4364_v35  ;;  %1537 = vmatmul.bf16.gmra.mxu2 %v4366_v36  ;;  %v1410_v10 = vpop.f32.mrf.mxu0  ;;  %v4399_v36 = vor.u32 %v3435_v27, %v2680_v60  ;;  %v1408_v60 = vadd.f32 %v1407_v13, %v4344_v59 }
  0xfa   : > { %1586 = vmatmul.bf16.gmra.mxu3 %v4373_v52  ;;  %v1430_v16 = vpop.f32.mrf.mxu2  ;;  %1635 = vmatmul.bf16.gmra.mxu0 %v4379_v1  ;;  %v3439_v52 = vld [vmem:[%s4146_s1 + $0x30] sm:$0xf0] }
  0xfb   : > { %v4383_v17 = vadd.f32 %v1430_v16, %v4344_v59  ;;  %v4401_v1 = vor.u32 %v3439_v52, %v2686_v63  ;;  %v3059_v52 = vor.u32 %v3531_v50, %v3056_v15  ;;  %v1411_v15 = vadd.f32 %v1410_v10, %v4344_v59 }
  0xfc   : > { %v4386_v24 = vpop.f32.mrf.mxu1 }
  0xfd   : > { %v1440_v18 = vpop.f32.mrf.mxu3  ;;  %4889 = vst [vmem:[#allocation28_spill] sm:$0xff] %v4401_v1  ;;  %1839 = vmatpush.bf16.msrb.mxu1 %v3059_v52 }
  0xfe   : > { %v4389_v25 = vadd.f32 %v1440_v18, %v4344_v59 }
  0xff   : > { %v1412_v29 = vpop.f32.mrf.mxu0 }
 0x102   : > { %v1432_v3 = vpop.f32.mrf.mxu2 }
 0x103   : > { %v4397_v12 = vadd.f32 %v1432_v3, %v4344_v59 }
 0x104   : > { %v1454_v18 = vpop.f32.mrf.mxu1 }
 0x105   : > { %v1442_v16 = vpop.f32.mrf.mxu3  ;;  %v1455_v20 = vadd.f32 %v1454_v18, %v1406_v2 }
 0x106   : > { %v4404_v34 = vadd.f32 %v1442_v16, %v4344_v59 }
 0x107   : > { %1649 = vmatmul.bf16.vlgmr.msra.gmra.mxu1 %v4399_v36  ;;  %1698 = vmatmul.bf16.vlgmr.msra.gmra.mxu2 %v4401_v1  ;;  %v1601_v27 = vpop.f32.mrf.mxu0 }
 0x10a   : > { %1747 = vmatmul.bf16.vlgmr.msra.gmra.mxu3 %v4176_v62  ;;  %v1503_v63 = vpop.f32.mrf.mxu2  ;;  %1796 = vmatmul.bf16.vlgmr.msra.gmra.mxu0 %v4206_v31  ;;  %v2708_v62 = vld [vmem:[%s4146_s1 + $0x64] sm:$0xf0] }
 0x10b   : > { %v1504_v3 = vadd.f32 %v1503_v63, %v1455_v20  ;;  %v4418_v52 = vor.u32 %v3442_v56, %v2708_v62  ;;  %v4420_v20 = vor.u32 %v3446_v46, %v2714_v57  ;;  %v1413_v57 = vadd.f32 %v1412_v29, %v4344_v59 }
 0x10c   : > { %v1456_v16 = vpop.f32.mrf.mxu1  ;;  %v1416_v29 = vadd.f32 %v4330_v19, %v4344_v59 }
 0x10d   : > { %v1552_v2 = vpop.f32.mrf.mxu3  ;;  %v1457_v18 = vadd.f32 %v1456_v16, %v1408_v60  ;;  %4890 = vst [vmem:[#allocation29_spill] sm:$0xff] %v4420_v20 }
 0x10e   : > { %v1553_v1 = vadd.f32 %v1552_v2, %v1504_v3 }
 0x10f   : > { %v1603_v48 = vpop.f32.mrf.mxu0 }
 0x110   : > { %v4411_v4 = vadd.f32 %v1601_v27, %v1553_v1  ;;  %v3529_v1 = vld [vmem:[#allocation5 + $0x144] sm:$0xf]  ;;  %v3048_v27 = vld [vmem:[#allocation5 + $0x148] sm:$0xf0] }
 0x111   : > { %v3051_v46 = vor.u32 %v3529_v1, %v3048_v27 }
 0x112   : > { %v1505_v50 = vpop.f32.mrf.mxu2 }
 0x113   : > { %v1506_v13 = vadd.f32 %v1505_v50, %v1457_v18  ;;  %1840 = vmatpush.bf16.msrb.mxu1 %v3051_v46 }
 0x114   : > { %v1459_v31 = vpop.f32.mrf.mxu1 }
 0x115   : > { %v1554_v43 = vpop.f32.mrf.mxu3  ;;  %v1460_v63 = vadd.f32 %v1459_v31, %v1411_v15  ;;  %v3449_v15 = vld [vmem:[%s4146_s1 + $0x84] sm:$0xf] }
 0x116   : > { %v1555_v60 = vadd.f32 %v1554_v43, %v1506_v13  ;;  %v2742_v13 = vld [vmem:[%s4146_s1 + $0x88] sm:$0xf]  ;;  %v3453_v31 = vld [vmem:[%s4146_s1 + $0xa0] sm:$0xf0] }
 0x117   : > { %1654 = vmatmul.bf16.gmra.mxu1 %v4418_v52  ;;  %1703 = vmatmul.bf16.gmra.mxu2 %v4420_v20  ;;  %v1606_v56 = vpop.f32.mrf.mxu0  ;;  %v4439_v46 = vor.u32 %v3453_v31, %v2742_v13 }
 0x118   : > { %v4422_v3 = vadd.f32 %v1603_v48, %v1555_v60 }
 0x119   : > { %4891 = vst [vmem:[#allocation30_spill] sm:$0xff] %v4439_v46 }
 0x11a   : > { %1752 = vmatmul.bf16.gmra.mxu3 %v4196_v61  ;;  %v1508_v10 = vpop.f32.mrf.mxu2  ;;  %1801 = vmatmul.bf16.gmra.mxu0 %v4226_v53  ;;  %v2736_v61 = vld [vmem:[%s4146_s1 + $0x9c] sm:$0xf0] }
 0x11b   : > { %v1509_v43 = vadd.f32 %v1508_v10, %v1460_v63  ;;  %v4437_v63 = vor.u32 %v3449_v15, %v2736_v61 }
 0x11c   : > { %v1461_v2 = vpop.f32.mrf.mxu1 }
 0x11d   : > { %v1557_v48 = vpop.f32.mrf.mxu3  ;;  %v1462_v16 = vadd.f32 %v1461_v2, %v1413_v57 }
 0x11e   : > { %v1558_v18 = vadd.f32 %v1557_v48, %v1509_v43  ;;  %v3527_v43 = vld [vmem:[#allocation5 + $0x134] sm:$0xf]  ;;  %v3040_v48 = vld [vmem:[#allocation5 + $0x138] sm:$0xf0] }
 0x11f   : > { %v1608_v50 = vpop.f32.mrf.mxu0  ;;  %v3043_v2 = vor.u32 %v3527_v43, %v3040_v48  ;;  %v1421_v43 = vadd.f32 %v4368_v38, %v4344_v59 }
 0x120   : > { %v4429_v62 = vadd.f32 %v1606_v56, %v1558_v18  ;;  %v1418_v18 = vadd.f32 %v4350_v5, %v4344_v59 }
 0x121   : > { %1841 = vmatpush.bf16.msrb.mxu1 %v3043_v2 }
 0x122   : > { %v1510_v60 = vpop.f32.mrf.mxu2 }
 0x123   : > { %v1511_v1 = vadd.f32 %v1510_v60, %v1462_v16 }
 0x124   : > { %v1464_v53 = vpop.f32.mrf.mxu1 }
 0x125   : > { %v1559_v27 = vpop.f32.mrf.mxu3  ;;  %v1465_v57 = vadd.f32 %v1464_v53, %v1416_v29  ;;  %v3456_v29 = vld [vmem:[%s4146_s1 + $0xbc] sm:$0xf] }
 0x126   : > { %v1560_v10 = vadd.f32 %v1559_v27, %v1511_v1  ;;  %v2764_v1 = vld [vmem:[%s4146_s1 + $0xd4] sm:$0xf0]  ;;  %v2770_v27 = vld [vmem:[%s4146_s1 + $0xc0] sm:$0xf]  ;;  %v3460_v53 = vld [vmem:[%s4146_s1 + $0xd8] sm:$0xf0] }
 0x127   : > { %1659 = vmatmul.bf16.gmra.mxu1 %v4437_v63  ;;  %1708 = vmatmul.bf16.gmra.mxu2 %v4439_v46  ;;  %v1611_v19 = vpop.f32.mrf.mxu0  ;;  %v4459_v2 = vor.u32 %v3460_v53, %v2770_v27 }
 0x128   : > { %v4441_v56 = vadd.f32 %v1608_v50, %v1560_v10 }
 0x129   : > { %4892 = vst [vmem:[#allocation31_spill] sm:$0xff] %v4459_v2 }
 0x12a   : > { %1757 = vmatmul.bf16.gmra.mxu3 %v4166_v44  ;;  %v1513_v16 = vpop.f32.mrf.mxu2  ;;  %1806 = vmatmul.bf16.gmra.mxu0 %v4246_v6 }
 0x12b   : > { %v1514_v15 = vadd.f32 %v1513_v16, %v1465_v57  ;;  %v4457_v57 = vor.u32 %v3456_v29, %v2764_v1 }
 0x12c   : > { %v1466_v61 = vpop.f32.mrf.mxu1 }
 0x12d   : > { %v1562_v50 = vpop.f32.mrf.mxu3  ;;  %v1467_v13 = vadd.f32 %v1466_v61, %v1418_v18 }
 0x12e   : > { %v1563_v31 = vadd.f32 %v1562_v50, %v1514_v15  ;;  %v3525_v15 = vld [vmem:[#allocation5 + $0x124] sm:$0xf]  ;;  %v3032_v50 = vld [vmem:[#allocation5 + $0x128] sm:$0xf0] }
 0x12f   : > { %v1613_v44 = vpop.f32.mrf.mxu0  ;;  %v3035_v61 = vor.u32 %v3525_v15, %v3032_v50 }
 0x130   : > { %v4449_v60 = vadd.f32 %v1611_v19, %v1563_v31  ;;  %v1423_v31 = vadd.f32 %v4386_v24, %v4344_v59 }
 0x131   : > { %1842 = vmatpush.bf16.msrb.mxu1 %v3035_v61 }
 0x132   : > { %v1515_v10 = vpop.f32.mrf.mxu2 }
 0x133   : > { %v1516_v48 = vadd.f32 %v1515_v10, %v1467_v13 }
 0x134   : > { %v1469_v6 = vpop.f32.mrf.mxu1 }
 0x135   : > { %v1564_v5 = vpop.f32.mrf.mxu3  ;;  %v1470_v16 = vadd.f32 %v1469_v6, %v1421_v43  ;;  %v3463_v43 = vld [vmem:[%s4146_s1 + $0xf4] sm:$0xf] }
 0x136   : > { %v1565_v18 = vadd.f32 %v1564_v5, %v1516_v48  ;;  %v2792_v48 = vld [vmem:[%s4146_s1 + $0x10c] sm:$0xf0]  ;;  %v2798_v5 = vld [vmem:[%s4146_s1 + $0xf8] sm:$0xf]  ;;  %v3467_v6 = vld [vmem:[%s4146_s1 + $0x110] sm:$0xf0] }
 0x137   : > { %1664 = vmatmul.bf16.gmra.mxu1 %v4457_v57  ;;  %1713 = vmatmul.bf16.gmra.mxu2 %v4459_v2  ;;  %v1616_v38 = vpop.f32.mrf.mxu0  ;;  %v4475_v61 = vor.u32 %v3463_v43, %v2792_v48  ;;  %v4477_v59 = vor.u32 %v3467_v6, %v2798_v5  ;;  %v3200_v48 = vld [vmem:[#allocation5 + $0x278] sm:$0xf0]  ;;  %v3549_v5 = vld [vmem:[#allocation5 + $0x1e4] sm:$0xf]  ;;  %v3128_v6 = vld [vmem:[#allocation5 + $0x1e8] sm:$0xf0] }
 0x138   : > { %v4461_v19 = vadd.f32 %v1613_v44, %v1565_v18 }
 0x139   : > { %4893 = vst [vmem:[#allocation32_spill] sm:$0xff] %v4477_v59 }
 0x13a   : > { %1762 = vmatmul.bf16.gmra.mxu3 %v4186_v40  ;;  %v1518_v13 = vpop.f32.mrf.mxu2  ;;  %1811 = vmatmul.bf16.gmra.mxu0 %v4266_v21 }
 0x13b   : > { %v1519_v29 = vadd.f32 %v1518_v13, %v1470_v16  ;;  %v3551_v13 = vld [vmem:[#allocation5 + $0x1f4] sm:$0xf] }
 0x13c   : > { %v1471_v1 = vpop.f32.mrf.mxu1 }
 0x13d   : > { %v1567_v44 = vpop.f32.mrf.mxu3  ;;  %v1472_v27 = vadd.f32 %v1471_v1, %v1423_v31  ;;  %v3136_v31 = vld [vmem:[#allocation5 + $0x1f8] sm:$0xf0] }
 0x13e   : > { %v1568_v53 = vadd.f32 %v1567_v44, %v1519_v29  ;;  %v3523_v44 = vld [vmem:[#allocation5 + $0x114] sm:$0xf]  ;;  %v3024_v1 = vld [vmem:[#allocation5 + $0x118] sm:$0xf0] }
 0x13f   : > { %v1618_v40 = vpop.f32.mrf.mxu0  ;;  %v3027_v43 = vor.u32 %v3523_v44, %v3024_v1  ;;  %v3547_v44 = vld [vmem:[#allocation5 + $0x1d4] sm:$0xf]  ;;  %v3120_v1 = vld [vmem:[#allocation5 + $0x1d8] sm:$0xf0] }
 0x140   : > { %v4469_v10 = vadd.f32 %v1616_v38, %v1568_v53  ;;  %v3139_v38 = vor.u32 %v3551_v13, %v3136_v31 }
 0x141   : > { %1843 = vmatpush.bf16.msrb.mxu1 %v3027_v43  ;;  %v2820_v43 = vld [vmem:[%s4146_s1 + $0x144] sm:$0xf0] }
 0x142   : > { %v1520_v18 = vpop.f32.mrf.mxu2  ;;  %1886 = vmatpush.bf16.msrb.mxu2 %v3139_v38 }
 0x143   : > { %v1521_v15 = vadd.f32 %v1520_v18, %v1472_v27  ;;  %v3567_v27 = vld [vmem:[#allocation5 + $0x274] sm:$0xf] }
 0x144   : > { %v1474_v24 = vpop.f32.mrf.mxu1 }
 0x145   : > { %v1569_v50 = vpop.f32.mrf.mxu3  ;;  %v1475_v21 = vadd.f32 %v1474_v24, %v4347_v0  ;;  %v3203_v0 = vor.u32 %v3567_v27, %v3200_v48  ;;  %v3565_v24 = vld [vmem:[#allocation5 + $0x264] sm:$0xf]  ;;  %v3470_v27 = vld [vmem:[%s4146_s1 + $0x12c] sm:$0xf]  ;;  %v3123_v48 = vor.u32 %v3547_v44, %v3120_v1 }
 0x146   : > { %v1570_v16 = vadd.f32 %v1569_v50, %v1521_v15  ;;  %v4493_v44 = vor.u32 %v3470_v27, %v2820_v43  ;;  %v3581_v1 = vld [vmem:[#allocation5 + $0x2e4] sm:$0xf]  ;;  %v3016_v27 = vld [vmem:[#allocation5 + $0x108] sm:$0xf0] }
 0x147   : > { %1669 = vmatmul.bf16.gmra.mxu1 %v4475_v61  ;;  %1718 = vmatmul.bf16.gmra.mxu2 %v4477_v59  ;;  %v1621_v53 = vpop.f32.mrf.mxu0  ;;  %v3474_v59 = vld [vmem:[%s4146_s1 + $0x148] sm:$0xf0] }
 0x148   : > { %v4480_v29 = vadd.f32 %v1618_v40, %v1570_v16  ;;  %v3131_v40 = vor.u32 %v3549_v5, %v3128_v6  ;;  %1935 = vmatpush.bf16.msrb.mxu3 %v3203_v0  ;;  %v3192_v16 = vld [vmem:[#allocation5 + $0x268] sm:$0xf0]  ;;  %v3184_v0 = vld [vmem:[#allocation5 + $0x258] sm:$0xf0]  ;;  %v3583_v5 = vld [vmem:[#allocation5 + $0x2f4] sm:$0xf] }
 0x149   : > { %v3195_v13 = vor.u32 %v3565_v24, %v3192_v16  ;;  %v3264_v24 = vld [vmem:[#allocation5 + $0x2f8] sm:$0xf0]  ;;  %4894 = vst [vmem:[#allocation33_spill] sm:$0xff] %v4493_v44 }
 0x14a   : > { %1767 = vmatmul.bf16.gmra.mxu3 %v4168_v45  ;;  %v1523_v18 = vpop.f32.mrf.mxu2  ;;  %1816 = vmatmul.bf16.gmra.mxu0 %v4286_v42  ;;  %v3563_v42 = vld [vmem:[#allocation5 + $0x254] sm:$0xf]  ;;  %v3267_v16 = vor.u32 %v3583_v5, %v3264_v24 }
 0x14b   : > { %v1524_v15 = vadd.f32 %v1523_v18, %v1475_v21  ;;  %1887 = vmatpush.bf16.msrb.mxu2 %v3131_v40  ;;  %v2826_v18 = vld [vmem:[%s4146_s1 + $0x130] sm:$0xf]  ;;  %v3187_v40 = vor.u32 %v3563_v42, %v3184_v0 }
 0x14c   : > { %v1476_v45 = vpop.f32.mrf.mxu1  ;;  %1936 = vmatpush.bf16.msrb.mxu3 %v3195_v13  ;;  %1984 = vmatpush.bf16.msrb.mxu0 %v3267_v16  ;;  %v3561_v13 = vld [vmem:[#allocation5 + $0x244] sm:$0xf] }
 0x14d   : > { %v1572_v50 = vpop.f32.mrf.mxu3  ;;  %v1477_v31 = vadd.f32 %v1476_v45, %v4362_v28  ;;  %v3545_v28 = vld [vmem:[#allocation5 + $0x1c4] sm:$0xf] }
 0x14e   : > { %v1573_v38 = vadd.f32 %v1572_v50, %v1524_v15  ;;  %v3112_v15 = vld [vmem:[#allocation5 + $0x1c8] sm:$0xf0] }
 0x14f   : > { %v1623_v6 = vpop.f32.mrf.mxu0  ;;  %1888 = vmatpush.bf16.msrb.mxu2 %v3123_v48  ;;  %v3115_v45 = vor.u32 %v3545_v28, %v3112_v15  ;;  %v3256_v48 = vld [vmem:[#allocation5 + $0x2e8] sm:$0xf0]  ;;  %v3543_v28 = vld [vmem:[#allocation5 + $0x1b4] sm:$0xf] }
 0x150   : > { %v4489_v21 = vadd.f32 %v1621_v53, %v1573_v38  ;;  %v4495_v53 = vor.u32 %v3474_v59, %v2826_v18  ;;  %1937 = vmatpush.bf16.msrb.mxu3 %v3187_v40  ;;  %v3176_v38 = vld [vmem:[#allocation5 + $0x248] sm:$0xf0]  ;;  %v3259_v24 = vor.u32 %v3581_v1, %v3256_v48  ;;  %v3521_v59 = vld [vmem:[#allocation5 + $0x104] sm:$0xf]  ;;  %v3559_v18 = vld [vmem:[#allocation5 + $0x234] sm:$0xf] }
 0x151   : > { %v3179_v5 = vor.u32 %v3561_v13, %v3176_v38 }
 0x152   : > { %v1525_v50 = vpop.f32.mrf.mxu2  ;;  %4895 = vst [vmem:[#allocation34_spill] sm:$0xff] %v4495_v53  ;;  %1985 = vmatpush.bf16.msrb.mxu0 %v3259_v24  ;;  %v3577_v24 = vld [vmem:[#allocation5 + $0x2c4] sm:$0xf] }
 0x153   : > { %v1526_v2 = vadd.f32 %v1525_v50, %v1477_v31  ;;  %1889 = vmatpush.bf16.msrb.mxu2 %v3115_v45  ;;  %v3104_v31 = vld [vmem:[#allocation5 + $0x1b8] sm:$0xf0]  ;;  %v3541_v50 = vld [vmem:[#allocation5 + $0x1a4] sm:$0xf]  ;;  %v3096_v45 = vld [vmem:[#allocation5 + $0x1a8] sm:$0xf0] }
 0x154   : > { %v1479_v20 = vpop.f32.mrf.mxu1  ;;  %v3107_v43 = vor.u32 %v3543_v28, %v3104_v31  ;;  %1938 = vmatpush.bf16.msrb.mxu3 %v3179_v5  ;;  %v3099_v38 = vor.u32 %v3541_v50, %v3096_v45  ;;  %v3240_v31 = vld [vmem:[#allocation5 + $0x2c8] sm:$0xf0]  ;;  %v3152_v50 = vld [vmem:[#allocation5 + $0x218] sm:$0xf0] }
 0x155   : > { %v1574_v46 = vpop.f32.mrf.mxu3  ;;  %v1480_v42 = vadd.f32 %v1479_v20, %v4383_v17  ;;  %v3019_v17 = vor.u32 %v3521_v59, %v3016_v27  ;;  %v3168_v20 = vld [vmem:[#allocation5 + $0x238] sm:$0xf0] }
 0x156   : > { %v1575_v0 = vadd.f32 %v1574_v46, %v1526_v2  ;;  %v3579_v46 = vld [vmem:[#allocation5 + $0x2d4] sm:$0xf]  ;;  %v3248_v2 = vld [vmem:[#allocation5 + $0x2d8] sm:$0xf0] }
 0x157   : > { %1674 = vmatmul.bf16.gmra.mxu1 %v4493_v44  ;;  %1723 = vmatmul.bf16.gmra.mxu2 %v4495_v53  ;;  %v1626_v40 = vpop.f32.mrf.mxu0  ;;  %v3251_v16 = vor.u32 %v3579_v46, %v3248_v2  ;;  %v3555_v2 = vld [vmem:[#allocation5 + $0x214] sm:$0xf]  ;;  %v3573_v53 = vld [vmem:[#allocation5 + $0x2a4] sm:$0xf] }
 0x158   : > { %v4498_v15 = vadd.f32 %v1623_v6, %v1575_v0  ;;  %1890 = vmatpush.bf16.msrb.mxu2 %v3107_v43  ;;  %v3171_v6 = vor.u32 %v3559_v18, %v3168_v20  ;;  %1844 = vmatpush.bf16.msrb.mxu1 %v3019_v17  ;;  %v3160_v0 = vld [vmem:[#allocation5 + $0x228] sm:$0xf0]  ;;  %v3539_v43 = vld [vmem:[#allocation5 + $0x194] sm:$0xf]  ;;  %v3088_v18 = vld [vmem:[#allocation5 + $0x198] sm:$0xf0] }
 0x159   : > { %1986 = vmatpush.bf16.msrb.mxu0 %v3251_v16  ;;  %v3477_v17 = vld [vmem:[%s4146_s1 + $0x164] sm:$0xf]  ;;  %v3091_v20 = vor.u32 %v3539_v43, %v3088_v18  ;;  %v3575_v16 = vld [vmem:[#allocation5 + $0x2b4] sm:$0xf]  ;;  %v3144_v18 = vld [vmem:[#allocation5 + $0x208] sm:$0xf0] }
 0x15a   : > { %1772 = vmatmul.bf16.gmra.mxu3 %v4188_v41  ;;  %v1528_v13 = vpop.f32.mrf.mxu2  ;;  %1821 = vmatmul.bf16.gmra.mxu0 %v4306_v39  ;;  %v3557_v41 = vld [vmem:[#allocation5 + $0x224] sm:$0xf]  ;;  %v2848_v39 = vld [vmem:[%s4146_s1 + $0x17c] sm:$0xf0] }
 0x15b   : > { %v1529_v1 = vadd.f32 %v1528_v13, %v1480_v42  ;;  %v3163_v5 = vor.u32 %v3557_v41, %v3160_v0  ;;  %1939 = vmatpush.bf16.msrb.mxu3 %v3171_v6  ;;  %v3243_v42 = vor.u32 %v3577_v24, %v3240_v31  ;;  %v2854_v13 = vld [vmem:[%s4146_s1 + $0x168] sm:$0xf]  ;;  %v3481_v41 = vld [vmem:[%s4146_s1 + $0x180] sm:$0xf0]  ;;  %v3155_v6 = vor.u32 %v3555_v2, %v3152_v50 }
 0x15c   : > { %v1481_v28 = vpop.f32.mrf.mxu1  ;;  %1891 = vmatpush.bf16.msrb.mxu2 %v3099_v38  ;;  %v3553_v43 = vld [vmem:[#allocation5 + $0x204] sm:$0xf] }
 0x15d   : > { %v1577_v48 = vpop.f32.mrf.mxu3  ;;  %v1482_v59 = vadd.f32 %v1481_v28, %v4397_v12  ;;  %1987 = vmatpush.bf16.msrb.mxu0 %v3243_v42  ;;  %v3232_v12 = vld [vmem:[#allocation5 + $0x2b8] sm:$0xf0]  ;;  %v3147_v42 = vor.u32 %v3553_v43, %v3144_v18  ;;  %v2876_v43 = vld [vmem:[%s4146_s1 + $0x1b4] sm:$0xf0]  ;;  %v2882_v18 = vld [vmem:[%s4146_s1 + $0x1a0] sm:$0xf] }
 0x15e   : > { %v1578_v27 = vadd.f32 %v1577_v48, %v1529_v1  ;;  %v3235_v38 = vor.u32 %v3575_v16, %v3232_v12  ;;  %v3537_v1 = vld [vmem:[#allocation5 + $0x184] sm:$0xf]  ;;  %v3080_v48 = vld [vmem:[#allocation5 + $0x188] sm:$0xf0]  ;;  %v3216_v12 = vld [vmem:[#allocation5 + $0x298] sm:$0xf0] }
 0x15f   : > { %v1628_v45 = vpop.f32.mrf.mxu0  ;;  %1940 = vmatpush.bf16.msrb.mxu3 %v3163_v5  ;;  %v3083_v24 = vor.u32 %v3537_v1, %v3080_v48  ;;  %v3224_v5 = vld [vmem:[#allocation5 + $0x2a8] sm:$0xf0] }
 0x160   : > { %v4507_v46 = vadd.f32 %v1626_v40, %v1578_v27  ;;  %1892 = vmatpush.bf16.msrb.mxu2 %v3091_v20  ;;  %v4511_v40 = vor.u32 %v3477_v17, %v2848_v39  ;;  %v4513_v27 = vor.u32 %v3481_v41, %v2854_v13  ;;  %v3227_v50 = vor.u32 %v3573_v53, %v3224_v5  ;;  %v3328_v17 = vld [vmem:[#allocation5 + $0x378] sm:$0xf0]  ;;  %v3571_v39 = vld [vmem:[#allocation5 + $0x294] sm:$0xf] }
 0x161   : > { %1988 = vmatpush.bf16.msrb.mxu0 %v3235_v38  ;;  %v3208_v38 = vld [vmem:[#allocation5 + $0x288] sm:$0xf0] }
 0x162   : > { %v1530_v0 = vpop.f32.mrf.mxu2 }
 0x163   : > { %v1531_v28 = vadd.f32 %v1530_v0, %v1482_v59  ;;  %1941 = vmatpush.bf16.msrb.mxu3 %v3155_v6  ;;  %v3599_v59 = vld [vmem:[#allocation5 + $0x374] sm:$0xf]  ;;  %v3569_v6 = vld [vmem:[#allocation5 + $0x284] sm:$0xf] }
 0x164   : > { %v1484_v44 = vpop.f32.mrf.mxu1  ;;  %1893 = vmatpush.bf16.msrb.mxu2 %v3083_v24  ;;  %v3331_v41 = vor.u32 %v3599_v59, %v3328_v17 }
 0x165   : > { %v1579_v31 = vpop.f32.mrf.mxu3  ;;  %v1485_v20 = vadd.f32 %v1484_v44, %v4353_v9  ;;  %1989 = vmatpush.bf16.msrb.mxu0 %v3227_v50  ;;  %v3219_v9 = vor.u32 %v3571_v39, %v3216_v12 }
 0x166   : > { %v1580_v2 = vadd.f32 %v1579_v31, %v1531_v28  ;;  %2033 = vmatpush.bf16.msra.mxu1 %v3331_v41  ;;  %v3484_v28 = vld [vmem:[%s4146_s1 + $0x19c] sm:$0xf]  ;;  %v3320_v41 = vld [vmem:[#allocation5 + $0x368] sm:$0xf0] }
 0x167   : > { %1679 = vmatmul.bf16.gmra.mxu1 %v4511_v40  ;;  %1728 = vmatmul.bf16.gmra.mxu2 %v4513_v27  ;;  %v1631_v13 = vpop.f32.mrf.mxu0 }
 0x168   : > { %v4516_v16 = vadd.f32 %v1628_v45, %v1580_v2  ;;  %1942 = vmatpush.bf16.msrb.mxu3 %v3147_v42  ;;  %v3488_v42 = vld [vmem:[%s4146_s1 + $0x1b8] sm:$0xf0] }
 0x169   : > { %1990 = vmatpush.bf16.msrb.mxu0 %v3219_v9  ;;  %v4531_v50 = vor.u32 %v3488_v42, %v2882_v18  ;;  %v3312_v42 = vld [vmem:[#allocation5 + $0x358] sm:$0xf0] }
 0x16a   : > { %1777 = vmatmul.bf16.gmra.mxu3 %v4170_v49  ;;  %v1533_v44 = vpop.f32.mrf.mxu2  ;;  %1826 = vmatmul.bf16.gmra.mxu0 %v4326_v14  ;;  %v3211_v49 = vor.u32 %v3569_v6, %v3208_v38  ;;  %v4529_v14 = vor.u32 %v3484_v28, %v2876_v43 }
 0x16b   : > { %v1534_v53 = vadd.f32 %v1533_v44, %v1485_v20 }
 0x16c   : > { %v1486_v1 = vpop.f32.mrf.mxu1 }
 0x16d   : > { %v1582_v45 = vpop.f32.mrf.mxu3  ;;  %v1487_v48 = vadd.f32 %v1486_v1, %v4371_v51  ;;  %1991 = vmatpush.bf16.msrb.mxu0 %v3211_v49 }
 0x16e   : > { %v1583_v0 = vadd.f32 %v1582_v45, %v1534_v53 }
 0x16f   : > { %v1633_v31 = vpop.f32.mrf.mxu0 }
 0x170   : > { %v4523_v24 = vadd.f32 %v1631_v13, %v1583_v0  ;;  %v3597_v13 = vld [vmem:[#allocation5 + $0x364] sm:$0xf] }
 0x171   : > { %v3323_v9 = vor.u32 %v3597_v13, %v3320_v41 }
 0x172   : > { %v1535_v5 = vpop.f32.mrf.mxu2 }
 0x173   : > { %v1536_v20 = vadd.f32 %v1535_v5, %v1487_v48  ;;  %2034 = vmatpush.bf16.msra.mxu1 %v3323_v9 }
 0x174   : > { %v1489_v59 = vpop.f32.mrf.mxu1 }
 0x175   : > { %v1584_v2 = vpop.f32.mrf.mxu3  ;;  %v1490_v17 = vadd.f32 %v1489_v59, %v4389_v25 }
 0x176   : > { %v1585_v51 = vadd.f32 %v1584_v2, %v1536_v20 }
 0x177   : > { %1684 = vmatmul.bf16.gmra.mxu1 %v4529_v14  ;;  %1733 = vmatmul.bf16.gmra.mxu2 %v4531_v50  ;;  %v1636_v12 = vpop.f32.mrf.mxu0 }
 0x178   : > { %v4534_v39 = vadd.f32 %v1633_v31, %v1585_v51 }
 0x17a   : > { %1782 = vmatmul.bf16.gmra.mxu3 %v4190_v47  ;;  %v1538_v44 = vpop.f32.mrf.mxu2  ;;  %1831 = vmatmul.bf16.gmra.mxu0 %v4364_v35  ;;  %v3595_v35 = vld [vmem:[#allocation5 + $0x354] sm:$0xf] }
 0x17b   : > { %v1539_v53 = vadd.f32 %v1538_v44, %v1490_v17  ;;  %v3315_v20 = vor.u32 %v3595_v35, %v3312_v42 }
 0x17c   : > { %v1491_v25 = vpop.f32.mrf.mxu1 }
 0x17d   : > { %v1587_v45 = vpop.f32.mrf.mxu3  ;;  %v1492_v6 = vadd.f32 %v1491_v25, %v4404_v34  ;;  %v4550_v34 = vperm.slane %v4336_v30, 1  ;;  %2035 = vmatpush.bf16.msra.mxu1 %v3315_v20 }
 0x17e   : > { %v1588_v38 = vadd.f32 %v1587_v45, %v1539_v53 }
 0x17f   : > { %v1638_v49 = vpop.f32.mrf.mxu0 }
 0x180   : > { %v4541_v1 = vadd.f32 %v1636_v12, %v1588_v38 }
 0x182   : > { %v1540_v48 = vpop.f32.mrf.mxu2 }
 0x183   : > { %v1541_v0 = vadd.f32 %v1540_v48, %v1492_v6  ;;  %v3304_v6 = vld [vmem:[#allocation5 + $0x348] sm:$0xf0] }
 0x184   : > { %v1650_v31 = vpop.f32.mrf.mxu1 }
 0x185   : > { %v1589_v28 = vpop.f32.mrf.mxu3  ;;  %v1651_v43 = vadd.f32 %v1650_v31, %v4411_v4 }
 0x186   : > { %v1590_v47 = vadd.f32 %v1589_v28, %v1541_v0 }
 0x187   : > { %1845 = vmatmul.bf16.vlgmr.msrb.gmra.mxu1 %v4208_v32  ;;  %1894 = vmatmul.bf16.vlgmr.msrb.gmra.mxu2 %v4210_v33  ;;  %v1797_v5 = vpop.f32.mrf.mxu0 }
 0x188   : > { %v4544_v18 = vadd.f32 %v1638_v49, %v1590_v47 }
 0x18a   : > { %1943 = vmatmul.bf16.vlgmr.msrb.gmra.mxu3 %v4216_v37  ;;  %v1699_v2 = vpop.f32.mrf.mxu2  ;;  %1992 = vmatmul.bf16.vlgmr.msrb.gmra.mxu0 %v4399_v36 }
 0x18b   : > { %v1700_v59 = vadd.f32 %v1699_v2, %v1651_v43 }
 0x18c   : > { %v1652_v4 = vpop.f32.mrf.mxu1 }
 0x18d   : > { %v1748_v17 = vpop.f32.mrf.mxu3  ;;  %v1653_v33 = vadd.f32 %v1652_v4, %v4422_v3  ;;  %v2082_v44 = vmax.f32 %v1700_v59, 0.0  ;;  %v3593_v3 = vld [vmem:[#allocation5 + $0x344] sm:$0xf] }
 0x18e   : > { %v1749_v32 = vadd.f32 %v1748_v17, %v4550_v34  ;;  %v3307_v49 = vor.u32 %v3593_v3, %v3304_v6 }
 0x18f   : > { %v1799_v13 = vpop.f32.mrf.mxu0 }
 0x190   : > { %v4555_v51 = vadd.f32 %v1797_v5, %v1749_v32  ;;  %2036 = vmatpush.bf16.msra.mxu1 %v3307_v49 }
 0x192   : > { %v1701_v37 = vpop.f32.mrf.mxu2 }
 0x193   : > { %v1702_v41 = vadd.f32 %v1701_v37, %v1653_v33 }
 0x194   : > { %v1655_v12 = vpop.f32.mrf.mxu1 }
 0x195   : > { %v1750_v30 = vpop.f32.mrf.mxu3  ;;  %v2084_v53 = vmax.f32 %v1702_v41, 0.0  ;;  %v1656_v45 = vadd.f32 %v1655_v12, %v4429_v62 }
 0x196   : > { %v1751_v9 = vadd.f32 %v1750_v30, %v4550_v34 }
 0x197   : > { %v4561_v36 = vpack.c.bf16 %v2084_v53, %v2082_v44  ;;  %1850 = vmatmul.bf16.gmra.mxu1 %v4228_v54  ;;  %1899 = vmatmul.bf16.gmra.mxu2 %v4230_v55  ;;  %v1802_v38 = vpop.f32.mrf.mxu0 }
 0x198   : > { %v4559_v25 = vadd.f32 %v1799_v13, %v1751_v9 }
 0x19a   : > { %1948 = vmatmul.bf16.gmra.mxu3 %v4236_v58  ;;  %v1704_v48 = vpop.f32.mrf.mxu2  ;;  %1997 = vmatmul.bf16.gmra.mxu0 %v4418_v52  ;;  %v3591_v52 = vld [vmem:[#allocation5 + $0x334] sm:$0xf] }
 0x19b   : > { %v1705_v0 = vadd.f32 %v1704_v48, %v1656_v45 }
 0x19c   : > { %v1657_v62 = vpop.f32.mrf.mxu1 }
 0x19d   : > { %v1753_v28 = vpop.f32.mrf.mxu3  ;;  %v1658_v47 = vadd.f32 %v1657_v62, %v4441_v56  ;;  %v2086_v20 = vmax.f32 %v1705_v0, 0.0  ;;  %v3296_v56 = vld [vmem:[#allocation5 + $0x338] sm:$0xf0] }
 0x19e   : > { %v1754_v31 = vadd.f32 %v1753_v28, %v4550_v34  ;;  %v3299_v33 = vor.u32 %v3591_v52, %v3296_v56  ;;  %v4896_v56 = vld [vmem:[#allocation16_spill] sm:$0xff] }
 0x19f   : > { %v1804_v55 = vpop.f32.mrf.mxu0 }
 0x1a0   : > { %v4569_v54 = vadd.f32 %v1802_v38, %v1754_v31  ;;  %2037 = vmatpush.bf16.msra.mxu1 %v3299_v33  ;;  %v3280_v33 = vld [vmem:[#allocation5 + $0x318] sm:$0xf0] }
 0x1a2   : > { %v1706_v43 = vpop.f32.mrf.mxu2 }
 0x1a3   : > { %v1707_v35 = vadd.f32 %v1706_v43, %v1658_v47 }
 0x1a4   : > { %v1660_v58 = vpop.f32.mrf.mxu1 }
 0x1a5   : > { %v1755_v42 = vpop.f32.mrf.mxu3  ;;  %v2088_v2 = vmax.f32 %v1707_v35, 0.0  ;;  %v1661_v59 = vadd.f32 %v1660_v58, %v4449_v60 }
 0x1a6   : > { %v1756_v5 = vadd.f32 %v1755_v42, %v4550_v34 }
 0x1a7   : > { %1855 = vmatmul.bf16.gmra.mxu1 %v4248_v7  ;;  %1904 = vmatmul.bf16.gmra.mxu2 %v4250_v8  ;;  %v4577_v4 = vpack.c.bf16 %v2088_v2, %v2086_v20  ;;  %v1807_v32 = vpop.f32.mrf.mxu0 }
 0x1a8   : > { %v4573_v17 = vadd.f32 %v1804_v55, %v1756_v5 }
 0x1aa   : > { %1953 = vmatmul.bf16.gmra.mxu3 %v4256_v11  ;;  %v1709_v13 = vpop.f32.mrf.mxu2  ;;  %2002 = vmatmul.bf16.gmra.mxu0 %v4437_v63  ;;  %v3589_v63 = vld [vmem:[#allocation5 + $0x324] sm:$0xf] }
 0x1ab   : > { %v1710_v37 = vadd.f32 %v1709_v13, %v1661_v59 }
 0x1ac   : > { %v1662_v60 = vpop.f32.mrf.mxu1 }
 0x1ad   : > { %v1758_v41 = vpop.f32.mrf.mxu3  ;;  %v1663_v7 = vadd.f32 %v1662_v60, %v4461_v19  ;;  %v2090_v3 = vmax.f32 %v1710_v37, 0.0  ;;  %v3288_v19 = vld [vmem:[#allocation5 + $0x328] sm:$0xf0]  ;;  %v4898_v37 = vld [vmem:[#allocation18_spill] sm:$0xff] }
 0x1ae   : > { %v1759_v30 = vadd.f32 %v1758_v41, %v4550_v34  ;;  %v3291_v28 = vor.u32 %v3589_v63, %v3288_v19 }
 0x1af   : > { %v1809_v12 = vpop.f32.mrf.mxu0 }
 0x1b0   : > { %v4583_v8 = vadd.f32 %v1807_v32, %v1759_v30  ;;  %2038 = vmatpush.bf16.msra.mxu1 %v3291_v28  ;;  %v4897_v32 = vld [vmem:[#allocation17_spill] sm:$0xff] }
 0x1b2   : > { %v1711_v9 = vpop.f32.mrf.mxu2 }
 0x1b3   : > { %v1712_v44 = vadd.f32 %v1711_v9, %v1663_v7  ;;  %v3607_v7 = vld [vmem:[#allocation8 + $0x30] sm:$0xff] }
 0x1b4   : > { %v1665_v11 = vpop.f32.mrf.mxu1 }
 0x1b5   : > { %v1760_v53 = vpop.f32.mrf.mxu3  ;;  %v2092_v6 = vmax.f32 %v1712_v44, 0.0  ;;  %v1666_v38 = vadd.f32 %v1665_v11, %v4469_v10 }
 0x1b6   : > { %v1761_v45 = vadd.f32 %v1760_v53, %v4550_v34 }
 0x1b7   : > { %1860 = vmatmul.bf16.gmra.mxu1 %v4268_v22  ;;  %1909 = vmatmul.bf16.gmra.mxu2 %v4270_v23  ;;  %v4591_v48 = vpack.c.bf16 %v2092_v6, %v2090_v3  ;;  %v1812_v0 = vpop.f32.mrf.mxu0 }
 0x1b8   : > { %v4587_v49 = vadd.f32 %v1809_v12, %v1761_v45  ;;  %v3606_v45 = vld [vmem:[#allocation8 + $0x28] sm:$0xff] }
 0x1ba   : > { %1958 = vmatmul.bf16.gmra.mxu3 %v4276_v26  ;;  %v1714_v62 = vpop.f32.mrf.mxu2  ;;  %2007 = vmatmul.bf16.gmra.mxu0 %v4457_v57  ;;  %v3608_v57 = vld [vmem:[#allocation8 + $0x38] sm:$0xff] }
 0x1bb   : > { %v1715_v31 = vadd.f32 %v1714_v62, %v1666_v38  ;;  %2262 = vmatpush.bf16.msra.mxu2 %v3608_v57  ;;  %v3605_v38 = vld [vmem:[#allocation8 + $0x20] sm:$0xff] }
 0x1bc   : > { %v1667_v10 = vpop.f32.mrf.mxu1 }
 0x1bd   : > { %v1763_v47 = vpop.f32.mrf.mxu3  ;;  %v1668_v22 = vadd.f32 %v1667_v10, %v4480_v29  ;;  %v2094_v20 = vmax.f32 %v1715_v31, 0.0  ;;  %v3587_v29 = vld [vmem:[#allocation5 + $0x314] sm:$0xf]  ;;  %v3604_v31 = vld [vmem:[#allocation8 + $0x18] sm:$0xff]  ;;  %v3585_v10 = vld [vmem:[#allocation5 + $0x304] sm:$0xf] }
 0x1be   : > { %v1764_v55 = vadd.f32 %v1763_v47, %v4550_v34  ;;  %v3283_v60 = vor.u32 %v3587_v29, %v3280_v33  ;;  %v4899_v47 = vld [vmem:[#allocation19_spill] sm:$0xff] }
 0x1bf   : > { %v1814_v43 = vpop.f32.mrf.mxu0  ;;  %2263 = vmatpush.bf16.msra.mxu2 %v3607_v7 }
 0x1c0   : > { %v4597_v23 = vadd.f32 %v1812_v0, %v1764_v55  ;;  %2039 = vmatpush.bf16.msra.mxu1 %v3283_v60  ;;  %v3272_v55 = vld [vmem:[#allocation5 + $0x308] sm:$0xf0] }
 0x1c2   : > { %v1716_v35 = vpop.f32.mrf.mxu2 }
 0x1c3   : > { %v1717_v42 = vadd.f32 %v1716_v35, %v1668_v22  ;;  %2264 = vmatpush.bf16.msra.mxu2 %v3606_v45 }
 0x1c4   : > { %v1670_v26 = vpop.f32.mrf.mxu1 }
 0x1c5   : > { %v1765_v58 = vpop.f32.mrf.mxu3  ;;  %v2096_v2 = vmax.f32 %v1717_v42, 0.0  ;;  %v1671_v59 = vadd.f32 %v1670_v26, %v4489_v21  ;;  %v3275_v42 = vor.u32 %v3585_v10, %v3272_v55  ;;  %v3603_v26 = vld [vmem:[#allocation8 + $0x10] sm:$0xff]  ;;  %v3616_v10 = vld [vmem:[#allocation8 + $0x78] sm:$0xff] }
 0x1c6   : > { %v1766_v5 = vadd.f32 %v1765_v58, %v4550_v34  ;;  %2311 = vmatpush.bf16.msra.mxu3 %v3616_v10 }
 0x1c7   : > { %1865 = vmatmul.bf16.gmra.mxu1 %v4896_v56  ;;  %1914 = vmatmul.bf16.gmra.mxu2 %v4897_v32  ;;  %v4605_v13 = vpack.c.bf16 %v2096_v2, %v2094_v20  ;;  %v1817_v41 = vpop.f32.mrf.mxu0  ;;  %v3602_v32 = vld [vmem:[#allocation8 + $0x8] sm:$0xff] }
 0x1c8   : > { %v4601_v52 = vadd.f32 %v1814_v43, %v1766_v5  ;;  %2265 = vmatpush.bf16.msra.mxu2 %v3605_v38  ;;  %v4901_v43 = vld [vmem:[#allocation21_spill] sm:$0xff]  ;;  %2040 = vmatpush.bf16.msra.mxu1 %v3275_v42 }
 0x1ca   : > { %1963 = vmatmul.bf16.gmra.mxu3 %v4898_v37  ;;  %v1719_v30 = vpop.f32.mrf.mxu2  ;;  %2012 = vmatmul.bf16.gmra.mxu0 %v4475_v61  ;;  %v3601_v37 = vld [vmem:[#allocation8] sm:$0xff] }
 0x1cb   : > { %v1720_v21 = vadd.f32 %v1719_v30, %v1671_v59 }
 0x1cc   : > { %v1672_v9 = vpop.f32.mrf.mxu1  ;;  %2266 = vmatpush.bf16.msra.mxu2 %v3604_v31 }
 0x1cd   : > { %v1768_v12 = vpop.f32.mrf.mxu3  ;;  %v1673_v53 = vadd.f32 %v1672_v9, %v4498_v15  ;;  %v2098_v61 = vmax.f32 %v1720_v21, 0.0  ;;  %v4900_v15 = vld [vmem:[#allocation20_spill] sm:$0xff]  ;;  %v4903_v9 = vld [vmem:[#allocation22_spill] sm:$0xff] }
 0x1ce   : > { %v1769_v44 = vadd.f32 %v1768_v12, %v4550_v34 }
 0x1cf   : > { %v4613_v3 = vpop.f32.mrf.mxu0 }
 0x1d0   : > { %v4611_v11 = vadd.f32 %v1817_v41, %v1769_v44  ;;  %2267 = vmatpush.bf16.msra.mxu2 %v3603_v26  ;;  %v4908_v26 = vld [vmem:[#allocation27_spill] sm:$0xff] }
 0x1d2   : > { %v1721_v6 = vpop.f32.mrf.mxu2 }
 0x1d3   : > { %v1722_v63 = vadd.f32 %v1721_v6, %v1673_v53  ;;  %v4905_v53 = vld [vmem:[#allocation24_spill] sm:$0xff] }
 0x1d4   : > { %v1675_v0 = vpop.f32.mrf.mxu1  ;;  %2268 = vmatpush.bf16.msra.mxu2 %v3602_v32 }
 0x1d5   : > { %v4615_v19 = vpop.f32.mrf.mxu3  ;;  %v2100_v28 = vmax.f32 %v1722_v63, 0.0  ;;  %v1676_v62 = vadd.f32 %v1675_v0, %v4507_v46  ;;  %v4902_v46 = vld [vmem:[#allocation33_spill] sm:$0xff] }
 0x1d7   : > { %1870 = vmatmul.bf16.gmra.mxu1 %v4899_v47  ;;  %1919 = vmatmul.bf16.gmra.mxu2 %v4900_v15  ;;  %v4620_v22 = vpack.c.bf16 %v2100_v28, %v2098_v61  ;;  %v1822_v35 = vpop.f32.mrf.mxu0 }
 0x1d8   : > { %2269 = vmatpush.bf16.msra.mxu2 %v3601_v37 }
 0x1da   : > { %1968 = vmatmul.bf16.gmra.mxu3 %v4901_v43  ;;  %v1724_v58 = vpop.f32.mrf.mxu2  ;;  %2017 = vmatmul.bf16.gmra.mxu0 %v4902_v46 }
 0x1db   : > { %v1725_v5 = vadd.f32 %v1724_v58, %v1676_v62  ;;  %v4907_v58 = vld [vmem:[#allocation26_spill] sm:$0xff] }
 0x1dc   : > { %v1677_v2 = vpop.f32.mrf.mxu1 }
 0x1dd   : > { %v1773_v20 = vpop.f32.mrf.mxu3  ;;  %v1678_v57 = vadd.f32 %v1677_v2, %v4516_v16  ;;  %v2102_v7 = vmax.f32 %v1725_v5, 0.0  ;;  %v4904_v16 = vld [vmem:[#allocation23_spill] sm:$0xff] }
 0x1de   : > { %v1774_v59 = vadd.f32 %v1773_v20, %v4550_v34 }
 0x1df   : > { %v4628_v29 = vpop.f32.mrf.mxu0 }
 0x1e0   : > { %v4626_v56 = vadd.f32 %v1822_v35, %v1774_v59 }
 0x1e2   : > { %v1726_v33 = vpop.f32.mrf.mxu2 }
 0x1e3   : > { %v1727_v41 = vadd.f32 %v1726_v33, %v1678_v57 }
 0x1e4   : > { %v1680_v30 = vpop.f32.mrf.mxu1 }
 0x1e5   : > { %v4630_v60 = vpop.f32.mrf.mxu3  ;;  %v2104_v21 = vmax.f32 %v1727_v41, 0.0  ;;  %v1681_v12 = vadd.f32 %v1680_v30, %v4523_v24  ;;  %v3615_v41 = vld [vmem:[#allocation8 + $0x70] sm:$0xff] }
 0x1e6   : > { %2312 = vmatpush.bf16.msra.mxu3 %v3615_v41 }
 0x1e7   : > { %1875 = vmatmul.bf16.gmra.mxu1 %v4903_v9  ;;  %1924 = vmatmul.bf16.gmra.mxu2 %v4904_v16  ;;  %v4635_v44 = vpack.c.bf16 %v2104_v21, %v2102_v7  ;;  %v1827_v45 = vpop.f32.mrf.mxu0  ;;  %v4909_v9 = vld [vmem:[#allocation28_spill] sm:$0xff] }
 0x1ea   : > { %1973 = vmatmul.bf16.gmra.mxu3 %v4905_v53  ;;  %v1729_v6 = vpop.f32.mrf.mxu2  ;;  %2022 = vmatmul.bf16.gmra.mxu0 %v4511_v40  ;;  %v4906_v40 = vld [vmem:[#allocation25_spill] sm:$0xff] }
 0x1eb   : > { %v1730_v38 = vadd.f32 %v1729_v6, %v1681_v12 }
 0x1ec   : > { %v1682_v0 = vpop.f32.mrf.mxu1 }
 0x1ed   : > { %v1778_v63 = vpop.f32.mrf.mxu3  ;;  %v1683_v28 = vadd.f32 %v1682_v0, %v4534_v39  ;;  %v2106_v43 = vmax.f32 %v1730_v38, 0.0  ;;  %v3614_v38 = vld [vmem:[#allocation8 + $0x68] sm:$0xff] }
 0x1ee   : > { %v1779_v61 = vadd.f32 %v1778_v63, %v4550_v34  ;;  %2313 = vmatpush.bf16.msra.mxu3 %v3614_v38  ;;  %v4910_v0 = vld [vmem:[#allocation29_spill] sm:$0xff] }
 0x1ef   : > { %v4645_v15 = vpop.f32.mrf.mxu0 }
 0x1f0   : > { %v4641_v24 = vadd.f32 %v1827_v45, %v1779_v61 }
 0x1f2   : > { %v1731_v62 = vpop.f32.mrf.mxu2 }
 0x1f3   : > { %v1732_v31 = vadd.f32 %v1731_v62, %v1683_v28 }
 0x1f4   : > { %v1685_v55 = vpop.f32.mrf.mxu1 }
 0x1f5   : > { %v4643_v47 = vpop.f32.mrf.mxu3  ;;  %v2108_v35 = vmax.f32 %v1732_v31, 0.0  ;;  %v1686_v42 = vadd.f32 %v1685_v55, %v4541_v1  ;;  %v3613_v31 = vld [vmem:[#allocation8 + $0x60] sm:$0xff] }
 0x1f6   : > { %2314 = vmatpush.bf16.msra.mxu3 %v3613_v31 }
 0x1f7   : > { %1880 = vmatmul.bf16.gmra.mxu1 %v4906_v40  ;;  %1929 = vmatmul.bf16.gmra.mxu2 %v4907_v58  ;;  %v4650_v39 = vpack.c.bf16 %v2108_v35, %v2106_v43  ;;  %v1832_v1 = vpop.f32.mrf.mxu0  ;;  %v3612_v40 = vld [vmem:[#allocation8 + $0x58] sm:$0xff] }
 0x1fa   : > { %1978 = vmatmul.bf16.gmra.mxu3 %v4908_v26  ;;  %v1734_v5 = vpop.f32.mrf.mxu2  ;;  %2027 = vmatmul.bf16.gmra.mxu0 %v4529_v14 }
 0x1fb   : > { %v1735_v20 = vadd.f32 %v1734_v5, %v1686_v42  ;;  %2315 = vmatpush.bf16.msra.mxu3 %v3612_v40 }
 0x1fc   : > { %v1687_v2 = vpop.f32.mrf.mxu1 }
 0x1fd   : > { %v1783_v46 = vpop.f32.mrf.mxu3  ;;  %v1688_v57 = vadd.f32 %v1687_v2, %v4544_v18  ;;  %v2110_v7 = vmax.f32 %v1735_v20, 0.0 }
 0x1fe   : > { %v1784_v59 = vadd.f32 %v1783_v46, %v4550_v34 }
 0x200   : > { %v4656_v32 = vadd.f32 %v1832_v1, %v1784_v59  ;;  %v3610_v1 = vld [vmem:[#allocation8 + $0x48] sm:$0xff] }
 0x202   : > { %v1736_v33 = vpop.f32.mrf.mxu2 }
 0x203   : > { %v1737_v37 = vadd.f32 %v1736_v33, %v1688_v57  ;;  %v4913_v57 = vld [vmem:[#allocation32_spill] sm:$0xff] }
 0x204   : > { %v1846_v30 = vpop.f32.mrf.mxu1 }
 0x205   : > { %v2112_v21 = vmax.f32 %v1737_v37, 0.0  ;;  %v1847_v12 = vadd.f32 %v1846_v30, %v4555_v51 }
 0x207   : > { %2041 = vmatmul.bf16.vlgmr.msra.gmra.mxu1 %v4909_v9  ;;  %2270 = vmatmul.bf16.vlgmr.msra.gmra.mxu2 %v4561_v36  ;;  %v4661_v14 = vpack.c.bf16 %v2112_v21, %v2110_v7  ;;  %v3609_v7 = vld [vmem:[#allocation8 + $0x40] sm:$0xff] }
 0x20a   : > { %v1895_v16 = vpop.f32.mrf.mxu2 }
 0x20b   : > { %v4663_v18 = vadd.f32 %v1895_v16, %v1847_v12 }
 0x20c   : > { %v1848_v53 = vpop.f32.mrf.mxu1 }
 0x20d   : > { %v4666_v45 = vadd.f32 %v1848_v53, %v4559_v25 }
 0x212   : > { %v4668_v6 = vpop.f32.mrf.mxu2 }
 0x214   : > { %v1851_v63 = vpop.f32.mrf.mxu1 }
 0x215   : > { %v1852_v51 = vadd.f32 %v1851_v63, %v4569_v54  ;;  %v4911_v54 = vld [vmem:[#allocation30_spill] sm:$0xff] }
 0x217   : > { %2046 = vmatmul.bf16.gmra.mxu1 %v4910_v0  ;;  %2275 = vmatmul.bf16.gmra.mxu2 %v4577_v4 }
 0x21a   : > { %v1900_v36 = vpop.f32.mrf.mxu2 }
 0x21b   : > { %v4673_v61 = vadd.f32 %v1900_v36, %v1852_v51 }
 0x21c   : > { %v1853_v28 = vpop.f32.mrf.mxu1 }
 0x21d   : > { %v4676_v62 = vadd.f32 %v1853_v28, %v4573_v17 }
 0x222   : > { %v4678_v25 = vpop.f32.mrf.mxu2 }
 0x224   : > { %v1856_v10 = vpop.f32.mrf.mxu1 }
 0x225   : > { %v1857_v55 = vadd.f32 %v1856_v10, %v4583_v8  ;;  %v4912_v8 = vld [vmem:[#allocation31_spill] sm:$0xff] }
 0x227   : > { %2051 = vmatmul.bf16.gmra.mxu1 %v4911_v54  ;;  %2280 = vmatmul.bf16.gmra.mxu2 %v4591_v48 }
 0x22a   : > { %v1905_v43 = vpop.f32.mrf.mxu2 }
 0x22b   : > { %v4683_v4 = vadd.f32 %v1905_v43, %v1857_v55 }
 0x22c   : > { %v1858_v35 = vpop.f32.mrf.mxu1 }
 0x22d   : > { %v4686_v42 = vadd.f32 %v1858_v35, %v4587_v49  ;;  %v3611_v49 = vld [vmem:[#allocation8 + $0x50] sm:$0xff] }
 0x22e   : > { %2316 = vmatpush.bf16.msra.mxu3 %v3611_v49  ;;  %v3623_v49 = vld [vmem:[#allocation10 + $0x30] sm:$0xff] }
 0x232   : > { %v4688_v17 = vpop.f32.mrf.mxu2  ;;  %2317 = vmatpush.bf16.msra.mxu3 %v3610_v1 }
 0x234   : > { %v1861_v58 = vpop.f32.mrf.mxu1 }
 0x235   : > { %v1862_v26 = vadd.f32 %v1861_v58, %v4597_v23 }
 0x236   : > { %2318 = vmatpush.bf16.msra.mxu3 %v3609_v7 }
 0x237   : > { %2056 = vmatmul.bf16.gmra.mxu1 %v4912_v8  ;;  %2285 = vmatmul.bf16.gmra.mxu2 %v4605_v13  ;;  %v4705_v13 = vpop.f32.mrf.mxu3 }
 0x23a   : > { %v1910_v5 = vpop.f32.mrf.mxu2 }
 0x23b   : > { %v4693_v48 = vadd.f32 %v1910_v5, %v1862_v26 }
 0x23c   : > { %v1863_v20 = vpop.f32.mrf.mxu1 }
 0x23d   : > { %v4696_v46 = vadd.f32 %v1863_v20, %v4601_v52  ;;  %v4914_v52 = vld [vmem:[#allocation34_spill] sm:$0xff] }
 0x23f   : > { %v1944_v30 = vpop.f32.mrf.mxu3 }
 0x240   : > { %v1945_v28 = vadd.f32 %v1944_v30, %v4663_v18 }
 0x242   : > { %v1912_v51 = vpop.f32.mrf.mxu2 }
 0x244   : > { %v1866_v2 = vpop.f32.mrf.mxu1 }
 0x245   : > { %v4699_v59 = vadd.f32 %v1866_v2, %v4611_v11  ;;  %v4712_v11 = vpop.f32.mrf.mxu0 }
 0x247   : > { %2061 = vmatmul.bf16.gmra.mxu1 %v4913_v57  ;;  %2290 = vmatmul.bf16.gmra.mxu2 %v4620_v22  ;;  %v1946_v9 = vpop.f32.mrf.mxu3 }
 0x24c   : > { %v4703_v23 = vpop.f32.mrf.mxu1 }
 0x24d   : > { %v1993_v22 = vpop.f32.mrf.mxu0 }
 0x24e   : > { %v1994_v55 = vadd.f32 %v1993_v22, %v1945_v28 }
 0x254   : > { %v1871_v33 = vpop.f32.mrf.mxu1 }
 0x255   : > { %v4708_v37 = vadd.f32 %v1871_v33, %v4626_v56  ;;  %v1995_v56 = vpop.f32.mrf.mxu0 }
 0x257   : > { %2066 = vmatmul.bf16.gmra.mxu1 %v4914_v52  ;;  %2295 = vmatmul.bf16.gmra.mxu2 %v4635_v44  ;;  %v1949_v44 = vpop.f32.mrf.mxu3 }
 0x258   : > { %v1950_v5 = vadd.f32 %v1949_v44, %v4673_v61 }
 0x25c   : > { %v4714_v41 = vpop.f32.mrf.mxu1 }
 0x25d   : > { %v1998_v63 = vpop.f32.mrf.mxu0 }
 0x25e   : > { %v1999_v2 = vadd.f32 %v1998_v63, %v1950_v5  ;;  %v3622_v63 = vld [vmem:[#allocation10 + $0x28] sm:$0xff] }
 0x264   : > { %v1876_v21 = vpop.f32.mrf.mxu1 }
 0x265   : > { %v4717_v12 = vadd.f32 %v1876_v21, %v4641_v24  ;;  %v1951_v24 = vpop.f32.mrf.mxu3 }
 0x267   : > { %2071 = vmatmul.bf16.gmra.mxu1 %v4513_v27  ;;  %2300 = vmatmul.bf16.gmra.mxu2 %v4650_v39  ;;  %v2000_v27 = vpop.f32.mrf.mxu0  ;;  %v1898_v39 = vadd.f32 %v4668_v6, %v4666_v45  ;;  %v1903_v45 = vadd.f32 %v4678_v25, %v4676_v62  ;;  %v1908_v62 = vadd.f32 %v4688_v17, %v4686_v42 }
 0x269   : > { %v1947_v10 = vadd.f32 %v1946_v9, %v1898_v39  ;;  %v1952_v20 = vadd.f32 %v1951_v24, %v1903_v45 }
 0x26b   : > { %v1996_v43 = vadd.f32 %v1995_v56, %v1947_v10  ;;  %v2001_v1 = vadd.f32 %v2000_v27, %v1952_v20  ;;  %v1915_v56 = vpop.f32.mrf.mxu2 }
 0x26c   : > { %v4721_v16 = vpop.f32.mrf.mxu1 }
 0x26d   : > { %v1954_v31 = vpop.f32.mrf.mxu3 }
 0x26e   : > { %v1955_v44 = vadd.f32 %v1954_v31, %v4683_v4 }
 0x26f   : > { %v2003_v54 = vpop.f32.mrf.mxu0 }
 0x270   : > { %v2004_v27 = vadd.f32 %v2003_v54, %v1955_v44  ;;  %v3621_v54 = vld [vmem:[#allocation10 + $0x20] sm:$0xff] }
 0x274   : > { %v1881_v53 = vpop.f32.mrf.mxu1 }
 0x275   : > { %v4724_v38 = vadd.f32 %v1881_v53, %v4656_v32  ;;  %v3624_v32 = vld [vmem:[#allocation10 + $0x38] sm:$0xff]  ;;  %v1956_v40 = vpop.f32.mrf.mxu3 }
 0x276   : > { %2452 = vmatpush.bf16.msra.mxu0 %v3624_v32  ;;  %v1957_v53 = vadd.f32 %v1956_v40, %v1908_v62 }
 0x277   : > { %2076 = vmatmul.bf16.gmra.mxu1 %v4531_v50  ;;  %2305 = vmatmul.bf16.gmra.mxu2 %v4661_v14  ;;  %v2005_v6 = vpop.f32.mrf.mxu0 }
 0x278   : > { %v2006_v39 = vadd.f32 %v2005_v6, %v1957_v53 }
 0x27a   : > { %2453 = vmatpush.bf16.msra.mxu0 %v3623_v49 }
 0x27c   : > { %v4728_v0 = vpop.f32.mrf.mxu1 }
 0x27d   : > { %v1959_v57 = vpop.f32.mrf.mxu3 }
 0x27e   : > { %2454 = vmatpush.bf16.msra.mxu0 %v3622_v63  ;;  %v1960_v4 = vadd.f32 %v1959_v57, %v4693_v48  ;;  %v1916_v48 = vadd.f32 %v1915_v56, %v4699_v59 }
 0x27f   : > { %v2008_v22 = vpop.f32.mrf.mxu0 }
 0x282   : > { %2455 = vmatpush.bf16.msra.mxu0 %v3621_v54 }
 0x284   : > { %v2042_v36 = vpop.f32.mrf.mxu1 }
 0x285   : > { %v2043_v50 = vadd.f32 %v2042_v36, %v1994_v55  ;;  %v1961_v25 = vpop.f32.mrf.mxu3  ;;  %v1917_v55 = vpop.f32.mrf.mxu2 }
 0x287   : > { %v2083_v58 = vmax.f32 %v2043_v50, 0.0  ;;  %v2010_v24 = vpop.f32.mrf.mxu0 }
 0x28c   : > { %v2044_v35 = vpop.f32.mrf.mxu1 }
 0x28d   : > { %v2045_v14 = vadd.f32 %v2044_v35, %v1996_v43  ;;  %v1964_v10 = vpop.f32.mrf.mxu3  ;;  %v1913_v35 = vadd.f32 %v1912_v51, %v4696_v46 }
 0x28f   : > { %v2085_v26 = vmax.f32 %v2045_v14, 0.0  ;;  %v2013_v17 = vpop.f32.mrf.mxu0  ;;  %v1962_v31 = vadd.f32 %v1961_v25, %v1913_v35 }
 0x291   : > { %v2115_v8 = vpack.c.bf16 %v2085_v26, %v2083_v58  ;;  %v1920_v58 = vpop.f32.mrf.mxu2  ;;  %v2009_v26 = vadd.f32 %v2008_v22, %v1960_v4  ;;  %v2011_v45 = vadd.f32 %v2010_v24, %v1962_v31 }
 0x293   : > { %2319 = vmatmul.bf16.vlgmr.msra.gmra.mxu3 %v2115_v8  ;;  %v1771_v8 = vadd.f32 %v4615_v19, %v4550_v34  ;;  %v1965_v19 = vadd.f32 %v1964_v10, %v1916_v48 }
 0x294   : > { %v2047_v18 = vpop.f32.mrf.mxu1 }
 0x295   : > { %v2048_v33 = vadd.f32 %v2047_v18, %v1999_v2  ;;  %v1966_v40 = vpop.f32.mrf.mxu3  ;;  %v1820_v46 = vadd.f32 %v4613_v3, %v1771_v8  ;;  %v1776_v3 = vadd.f32 %v4630_v60, %v4550_v34 }
 0x297   : > { %v2087_v7 = vmax.f32 %v2048_v33, 0.0  ;;  %v2015_v18 = vpop.f32.mrf.mxu0  ;;  %v1869_v2 = vadd.f32 %v4703_v23, %v1820_v46  ;;  %v1825_v44 = vadd.f32 %v4628_v29, %v1776_v3  ;;  %v1781_v29 = vadd.f32 %v4643_v47, %v4550_v34  ;;  %v3617_v46 = vld [vmem:[#allocation10] sm:$0xff] }
 0x299   : > { %v1922_v33 = vpop.f32.mrf.mxu2 }
 0x29c   : > { %v2049_v52 = vpop.f32.mrf.mxu1 }
 0x29d   : > { %v2050_v30 = vadd.f32 %v2049_v52, %v2001_v1  ;;  %v1969_v57 = vpop.f32.mrf.mxu3  ;;  %v1918_v52 = vadd.f32 %v1917_v55, %v1869_v2  ;;  %v1786_v2 = vadd.f32 %v4705_v13, %v4550_v34 }
 0x29f   : > { %v2089_v21 = vmax.f32 %v2050_v30, 0.0  ;;  %v2018_v22 = vpop.f32.mrf.mxu0 }
 0x2a1   : > { %v2117_v9 = vpack.c.bf16 %v2089_v21, %v2087_v7  ;;  %v1967_v7 = vadd.f32 %v1966_v40, %v1918_v52  ;;  %v3620_v21 = vld [vmem:[#allocation10 + $0x18] sm:$0xff]  ;;  %v1925_v56 = vpop.f32.mrf.mxu2  ;;  %v1835_v52 = vadd.f32 %v4712_v11, %v1786_v2 }
 0x2a2   : > { %2456 = vmatpush.bf16.msra.mxu0 %v3620_v21 }
 0x2a3   : > { %2324 = vmatmul.bf16.gmra.mxu3 %v2117_v9  ;;  %v2014_v9 = vadd.f32 %v2013_v17, %v1965_v19  ;;  %v2016_v62 = vadd.f32 %v2015_v18, %v1967_v7  ;;  %v3618_v18 = vld [vmem:[#allocation10 + $0x8] sm:$0xff]  ;;  %v1884_v7 = vadd.f32 %v4728_v0, %v1835_v52 }
 0x2a4   : > { %v2052_v61 = vpop.f32.mrf.mxu1 }
 0x2a5   : > { %v2053_v36 = vadd.f32 %v2052_v61, %v2004_v27  ;;  %v1971_v25 = vpop.f32.mrf.mxu3  ;;  %v1921_v27 = vadd.f32 %v1920_v58, %v4708_v37 }
 0x2a7   : > { %v2091_v43 = vmax.f32 %v2053_v36, 0.0  ;;  %v2020_v24 = vpop.f32.mrf.mxu0  ;;  %v1970_v60 = vadd.f32 %v1969_v57, %v1921_v27 }
 0x2a9   : > { %v1927_v55 = vpop.f32.mrf.mxu2 }
 0x2ac   : > { %v2054_v28 = vpop.f32.mrf.mxu1 }
 0x2ad   : > { %v2055_v32 = vadd.f32 %v2054_v28, %v2006_v39  ;;  %v1874_v39 = vadd.f32 %v4714_v41, %v1825_v44  ;;  %v1830_v41 = vadd.f32 %v4645_v15, %v1781_v29 }
 0x2af   : > { %v2093_v50 = vmax.f32 %v2055_v32, 0.0  ;;  %v1923_v28 = vadd.f32 %v1922_v33, %v1874_v39  ;;  %v1974_v32 = vpop.f32.mrf.mxu3  ;;  %v2023_v17 = vpop.f32.mrf.mxu0  ;;  %v1879_v8 = vadd.f32 %v4721_v16, %v1830_v41 }
 0x2b1   : > { %v2119_v42 = vpack.c.bf16 %v2093_v50, %v2091_v43  ;;  %v1972_v43 = vadd.f32 %v1971_v25, %v1923_v28  ;;  %v3619_v50 = vld [vmem:[#allocation10 + $0x10] sm:$0xff]  ;;  %v1930_v58 = vpop.f32.mrf.mxu2 }
 0x2b2   : > { %2457 = vmatpush.bf16.msra.mxu0 %v3619_v50 }
 0x2b3   : > { %2329 = vmatmul.bf16.gmra.mxu3 %v2119_v42  ;;  %v2019_v42 = vadd.f32 %v2018_v22, %v1970_v60  ;;  %v2021_v35 = vadd.f32 %v2020_v24, %v1972_v43  ;;  %v1931_v22 = vadd.f32 %v1930_v58, %v4724_v38 }
 0x2b4   : > { %v2057_v14 = vpop.f32.mrf.mxu1 }
 0x2b5   : > { %v2058_v6 = vadd.f32 %v2057_v14, %v2009_v26  ;;  %v1926_v26 = vadd.f32 %v1925_v56, %v4717_v12 }
 0x2b6   : > { %2458 = vmatpush.bf16.msra.mxu0 %v3618_v18 }
 0x2b7   : > { %v2095_v51 = vmax.f32 %v2058_v6, 0.0  ;;  %v1976_v31 = vpop.f32.mrf.mxu3  ;;  %v1928_v6 = vadd.f32 %v1927_v55, %v1879_v8 }
 0x2b9   : > { %v1932_v48 = vpop.f32.mrf.mxu2 }
 0x2ba   : > { %2459 = vmatpush.bf16.msra.mxu0 %v3617_v46 }
 0x2bc   : > { %v2059_v5 = vpop.f32.mrf.mxu1 }
 0x2bd   : > { %v2060_v20 = vadd.f32 %v2059_v5, %v2011_v45  ;;  %v2025_v5 = vpop.f32.mrf.mxu0 }
 0x2bf   : > { %v2097_v49 = vmax.f32 %v2060_v20, 0.0  ;;  %v1975_v20 = vadd.f32 %v1974_v32, %v1926_v26  ;;  %v1979_v15 = vpop.f32.mrf.mxu3 }
 0x2c0   : > { %v1980_v34 = vadd.f32 %v1979_v15, %v1931_v22 }
 0x2c1   : > { %v2121_v1 = vpack.c.bf16 %v2097_v49, %v2095_v51  ;;  %v1977_v51 = vadd.f32 %v1976_v31, %v1928_v6  ;;  %v2024_v49 = vadd.f32 %v2023_v17, %v1975_v20 }
 0x2c3   : > { %2334 = vmatmul.bf16.gmra.mxu3 %v2121_v1  ;;  %v2026_v12 = vadd.f32 %v2025_v5, %v1977_v51 }
 0x2c4   : > { %v2062_v30 = vpop.f32.mrf.mxu1 }
 0x2c5   : > { %v2063_v59 = vadd.f32 %v2062_v30, %v2014_v9  ;;  %v2028_v33 = vpop.f32.mrf.mxu0  ;;  %v1933_v9 = vadd.f32 %v1932_v48, %v1884_v7 }
 0x2c6   : > { %v2029_v56 = vadd.f32 %v2028_v33, %v1980_v34 }
 0x2c7   : > { %v2099_v53 = vmax.f32 %v2063_v59, 0.0  ;;  %v1981_v3 = vpop.f32.mrf.mxu3 }
 0x2c8   : > { %v1982_v13 = vadd.f32 %v1981_v3, %v1933_v9 }
 0x2cc   : > { %v2064_v23 = vpop.f32.mrf.mxu1 }
 0x2cd   : > { %v2065_v61 = vadd.f32 %v2064_v23, %v2016_v62  ;;  %v2271_v62 = vpop.f32.mrf.mxu2  ;;  %v2030_v59 = vpop.f32.mrf.mxu0 }
 0x2ce   : > { %v2031_v23 = vadd.f32 %v2030_v59, %v1982_v13 }
 0x2cf   : > { %v2101_v63 = vmax.f32 %v2065_v61, 0.0 }
 0x2d1   : > { %v2123_v36 = vpack.c.bf16 %v2101_v63, %v2099_v53 }
 0x2d3   : > { %2339 = vmatmul.bf16.gmra.mxu3 %v2123_v36  ;;  %v4764_v36 = vld [vmem:[%s4842_s4] ss:$0 sm:$0xff] }
 0x2d4   : > { %v2067_v10 = vpop.f32.mrf.mxu1  ;;  %v2272_v28 = vadd.f32 %v4764_v36, %v2271_v62 }
 0x2d5   : > { %v2068_v14 = vadd.f32 %v2067_v10, %v2019_v42  ;;  %v2273_v53 = vpop.f32.mrf.mxu2 }
 0x2d6   : > { %v2274_v60 = vadd.f32 %v4764_v36, %v2273_v53 }
 0x2d7   : > { %v2103_v40 = vmax.f32 %v2068_v14, 0.0 }
 0x2dc   : > { %v2069_v37 = vpop.f32.mrf.mxu1 }
 0x2dd   : > { %v2070_v4 = vadd.f32 %v2069_v37, %v2021_v35  ;;  %v2276_v0 = vpop.f32.mrf.mxu2 }
 0x2de   : > { %v2277_v14 = vadd.f32 %v4764_v36, %v2276_v0 }
 0x2df   : > { %v2105_v54 = vmax.f32 %v2070_v4, 0.0 }
 0x2e1   : > { %v2125_v45 = vpack.c.bf16 %v2105_v54, %v2103_v40 }
 0x2e3   : > { %2344 = vmatmul.bf16.gmra.mxu3 %v2125_v45 }
 0x2e4   : > { %v2072_v47 = vpop.f32.mrf.mxu1 }
 0x2e5   : > { %v2073_v57 = vadd.f32 %v2072_v47, %v2024_v49  ;;  %v2278_v27 = vpop.f32.mrf.mxu2 }
 0x2e6   : > { %v2279_v37 = vadd.f32 %v4764_v36, %v2278_v27 }
 0x2e7   : > { %v2107_v30 = vmax.f32 %v2073_v57, 0.0 }
 0x2ec   : > { %v2074_v16 = vpop.f32.mrf.mxu1 }
 0x2ed   : > { %v2075_v1 = vadd.f32 %v2074_v16, %v2026_v12  ;;  %v2281_v10 = vpop.f32.mrf.mxu2 }
 0x2ee   : > { %v2282_v6 = vadd.f32 %v4764_v36, %v2281_v10 }
 0x2ef   : > { %v2109_v19 = vmax.f32 %v2075_v1, 0.0 }
 0x2f1   : > { %v2127_v21 = vpack.c.bf16 %v2109_v19, %v2107_v30 }
 0x2f3   : > { %2349 = vmatmul.bf16.gmra.mxu3 %v2127_v21 }
 0x2f4   : > { %v2077_v25 = vpop.f32.mrf.mxu1 }
 0x2f5   : > { %v2078_v61 = vadd.f32 %v2077_v25, %v2029_v56  ;;  %v2283_v29 = vpop.f32.mrf.mxu2 }
 0x2f6   : > { %v2284_v18 = vadd.f32 %v4764_v36, %v2283_v29 }
 0x2f7   : > { %v2111_v63 = vmax.f32 %v2078_v61, 0.0 }
 0x2fc   : > { %v2079_v44 = vpop.f32.mrf.mxu1 }
 0x2fd   : > { %v2080_v11 = vadd.f32 %v2079_v44, %v2031_v23  ;;  %v2286_v40 = vpop.f32.mrf.mxu2 }
 0x2fe   : > { %v2287_v2 = vadd.f32 %v4764_v36, %v2286_v40 }
 0x2ff   : > { %v2113_v24 = vmax.f32 %v2080_v11, 0.0 }
 0x301   : > { %v2129_v38 = vpack.c.bf16 %v2113_v24, %v2111_v63 }
 0x303   : > { %2354 = vmatmul.bf16.gmra.mxu3 %v2129_v38 }
 0x305   : > { %v2288_v45 = vpop.f32.mrf.mxu2 }
 0x306   : > { %v2289_v12 = vadd.f32 %v4764_v36, %v2288_v45 }
 0x30d   : > { %v2291_v15 = vpop.f32.mrf.mxu2 }
 0x30e   : > { %v2292_v21 = vadd.f32 %v4764_v36, %v2291_v15 }
 0x315   : > { %v2293_v16 = vpop.f32.mrf.mxu2 }
 0x316   : > { %v2320_v39 = vpop.f32.mrf.mxu3  ;;  %v2294_v9 = vadd.f32 %v4764_v36, %v2293_v16 }
 0x317   : > { %v2321_v32 = vadd.f32 %v2320_v39, %v2272_v28 }
 0x319   : > { %v2360_v50 = vmax.f32 %v2321_v32, 0.0 }
 0x31d   : > { %v2296_v7 = vpop.f32.mrf.mxu2 }
 0x31e   : > { %v2322_v55 = vpop.f32.mrf.mxu3  ;;  %v2297_v61 = vadd.f32 %v4764_v36, %v2296_v7 }
 0x31f   : > { %v2323_v43 = vadd.f32 %v2322_v55, %v2274_v60 }
 0x321   : > { %v2361_v42 = vmax.f32 %v2323_v43, 0.0 }
 0x323   : > { %v2376_v17 = vpack.c.bf16 %v2361_v42, %v2360_v50 }
 0x325   : > { %2460 = vmatmul.bf16.vlgmr.msra.gmra.mxu0 %v2376_v17  ;;  %v2298_v59 = vpop.f32.mrf.mxu2 }
 0x326   : > { %v2325_v35 = vpop.f32.mrf.mxu3  ;;  %v2299_v11 = vadd.f32 %v4764_v36, %v2298_v59 }
 0x327   : > { %v2326_v4 = vadd.f32 %v2325_v35, %v2277_v14 }
 0x329   : > { %v2362_v54 = vmax.f32 %v2326_v4, 0.0 }
 0x32d   : > { %v2301_v44 = vpop.f32.mrf.mxu2 }
 0x32e   : > { %v2327_v41 = vpop.f32.mrf.mxu3  ;;  %v2302_v10 = vadd.f32 %v4764_v36, %v2301_v44 }
 0x32f   : > { %v2328_v31 = vadd.f32 %v2327_v41, %v2279_v37 }
 0x331   : > { %v2363_v58 = vmax.f32 %v2328_v31, 0.0 }
 0x333   : > { %v2377_v26 = vpack.c.bf16 %v2363_v58, %v2362_v54 }
 0x335   : > { %2465 = vmatmul.bf16.gmra.mxu0 %v2377_v26  ;;  %v2303_v39 = vpop.f32.mrf.mxu2 }
 0x336   : > { %v2330_v8 = vpop.f32.mrf.mxu3  ;;  %v2304_v60 = vadd.f32 %v4764_v36, %v2303_v39 }
 0x337   : > { %v2331_v5 = vadd.f32 %v2330_v8, %v2282_v6  ;;  %v3749_v8 = vld [vmem:[%s4844_s6] ss:$0 sm:$0xff] }
 0x339   : > { %v2364_v46 = vmax.f32 %v2331_v5, 0.0 }
 0x33d   : > { %v2306_v50 = vpop.f32.mrf.mxu2 }
 0x33e   : > { %v2332_v47 = vpop.f32.mrf.mxu3  ;;  %v2307_v37 = vadd.f32 %v4764_v36, %v2306_v50 }
 0x33f   : > { %v2333_v20 = vadd.f32 %v2332_v47, %v2284_v18 }
 0x341   : > { %v2365_v51 = vmax.f32 %v2333_v20, 0.0 }
 0x343   : > { %v2378_v49 = vpack.c.bf16 %v2365_v51, %v2364_v46 }
 0x345   : > { %2470 = vmatmul.bf16.gmra.mxu0 %v2378_v49  ;;  %v2308_v14 = vpop.f32.mrf.mxu2 }
 0x346   : > { %v2335_v48 = vpop.f32.mrf.mxu3  ;;  %v2309_v4 = vadd.f32 %v4764_v36, %v2308_v14 }
 0x347   : > { %v2336_v57 = vadd.f32 %v2335_v48, %v2287_v2 }
 0x349   : > { %v2366_v52 = vmax.f32 %v2336_v57, 0.0 }
 0x34e   : > { %v2337_v1 = vpop.f32.mrf.mxu3 }
 0x34f   : > { %v2338_v33 = vadd.f32 %v2337_v1, %v2289_v12 }
 0x351   : > { %v2367_v30 = vmax.f32 %v2338_v33, 0.0 }
 0x353   : > { %v2379_v19 = vpack.c.bf16 %v2367_v30, %v2366_v52 }
 0x355   : > { %2475 = vmatmul.bf16.gmra.mxu0 %v2379_v19 }
 0x356   : > { %v2340_v22 = vpop.f32.mrf.mxu3 }
 0x357   : > { %v2341_v3 = vadd.f32 %v2340_v22, %v2292_v21 }
 0x359   : > { %v2368_v34 = vmax.f32 %v2341_v3, 0.0 }
 0x35e   : > { %v2342_v62 = vpop.f32.mrf.mxu3 }
 0x35f   : > { %v2343_v25 = vadd.f32 %v2342_v62, %v2294_v9 }
 0x361   : > { %v2369_v13 = vmax.f32 %v2343_v25, 0.0 }
 0x363   : > { %v2380_v56 = vpack.c.bf16 %v2369_v13, %v2368_v34 }
 0x365   : > { %2480 = vmatmul.bf16.gmra.mxu0 %v2380_v56 }
 0x366   : > { %v2345_v23 = vpop.f32.mrf.mxu3 }
 0x367   : > { %v2346_v53 = vadd.f32 %v2345_v23, %v2297_v61 }
 0x369   : > { %v2370_v38 = vmax.f32 %v2346_v53, 0.0 }
 0x36e   : > { %v2347_v63 = vpop.f32.mrf.mxu3 }
 0x36f   : > { %v2348_v24 = vadd.f32 %v2347_v63, %v2299_v11 }
 0x371   : > { %v2371_v0 = vmax.f32 %v2348_v24, 0.0 }
 0x373   : > { %v2381_v27 = vpack.c.bf16 %v2371_v0, %v2370_v38 }
 0x375   : > { %2485 = vmatmul.bf16.gmra.mxu0 %v2381_v27 }
 0x376   : > { %v2350_v28 = vpop.f32.mrf.mxu3 }
 0x377   : > { %v2351_v32 = vadd.f32 %v2350_v28, %v2302_v10 }
 0x379   : > { %v2372_v42 = vmax.f32 %v2351_v32, 0.0 }
 0x37e   : > { %v2352_v55 = vpop.f32.mrf.mxu3 }
 0x37f   : > { %v2353_v43 = vadd.f32 %v2352_v55, %v2304_v60 }
 0x381   : > { %v2373_v17 = vmax.f32 %v2353_v43, 0.0 }
 0x383   : > { %v2382_v29 = vpack.c.bf16 %v2373_v17, %v2372_v42 }
 0x385   : > { %2490 = vmatmul.bf16.gmra.mxu0 %v2382_v29 }
 0x386   : > { %v2355_v35 = vpop.f32.mrf.mxu3 }
 0x387   : > { %v2356_v41 = vadd.f32 %v2355_v35, %v2307_v37 }
 0x389   : > { %v2374_v54 = vmax.f32 %v2356_v41, 0.0 }
 0x38e   : > { %v2357_v31 = vpop.f32.mrf.mxu3 }
 0x38f   : > { %v2358_v40 = vadd.f32 %v2357_v31, %v2309_v4 }
 0x391   : > { %v2375_v58 = vmax.f32 %v2358_v40, 0.0 }
 0x393   : > { %v2383_v26 = vpack.c.bf16 %v2375_v58, %v2374_v54 }
 0x395   : > { %2495 = vmatmul.bf16.gmra.mxu0 %v2383_v26 }
 0x3a2   : > { %v2461_v45 = vpop.f32.mrf.mxu0 }
 0x3a3   : > { %v2462_v6 = vadd.f32 %v3749_v8, %v2461_v45 }
 0x3a5   : > { %2501 = vst [vmem:[%s4786_s20] sm:$0xff] %v2462_v6 }
 0x3aa   : > { %v2463_v36 = vpop.f32.mrf.mxu0 }
 0x3ab   : > { %v2464_v18 = vadd.f32 %v3749_v8, %v2463_v36 }
 0x3ad   : > { %2502 = vst [vmem:[%s4786_s20 + $0x8] sm:$0xff] %v2464_v18 }
 0x3b2   : > { %v2466_v5 = vpop.f32.mrf.mxu0 }
 0x3b3   : > { %v2467_v47 = vadd.f32 %v3749_v8, %v2466_v5 }
 0x3b5   : > { %2503 = vst [vmem:[%s4786_s20 + $0x10] sm:$0xff] %v2467_v47 }
 0x3ba   : > { %v2468_v20 = vpop.f32.mrf.mxu0 }
 0x3bb   : > { %v2469_v46 = vadd.f32 %v3749_v8, %v2468_v20 }
 0x3bd   : > { %2504 = vst [vmem:[%s4786_s20 + $0x18] sm:$0xff] %v2469_v46 }
 0x3c2   : > { %v2471_v51 = vpop.f32.mrf.mxu0 }
 0x3c3   : > { %v2472_v49 = vadd.f32 %v3749_v8, %v2471_v51 }
 0x3c5   : > { %2505 = vst [vmem:[%s4786_s20 + $0x20] sm:$0xff] %v2472_v49 }
 0x3ca   : > { %v2473_v15 = vpop.f32.mrf.mxu0 }
 0x3cb   : > { %v2474_v48 = vadd.f32 %v3749_v8, %v2473_v15 }
 0x3cd   : > { %2506 = vst [vmem:[%s4786_s20 + $0x28] sm:$0xff] %v2474_v48 }
 0x3d2   : > { %v2476_v2 = vpop.f32.mrf.mxu0 }
 0x3d3   : > { %v2477_v12 = vadd.f32 %v3749_v8, %v2476_v2 }
 0x3d5   : > { %2507 = vst [vmem:[%s4786_s20 + $0x30] sm:$0xff] %v2477_v12 }
 0x3da   : > { %v2478_v57 = vpop.f32.mrf.mxu0 }
 0x3db   : > { %v2479_v16 = vadd.f32 %v3749_v8, %v2478_v57 }
 0x3dd   : > { %2508 = vst [vmem:[%s4786_s20 + $0x38] sm:$0xff] %v2479_v16 }
 0x3e2   : > { %v2481_v1 = vpop.f32.mrf.mxu0 }
 0x3e3   : > { %v2482_v33 = vadd.f32 %v3749_v8, %v2481_v1 }
 0x3e5   : > { %2509 = vst [vmem:[%s4786_s20 + $0x40] sm:$0xff] %v2482_v33 }
 0x3ea   : > { %v2483_v52 = vpop.f32.mrf.mxu0 }
 0x3eb   : > { %v2484_v30 = vadd.f32 %v3749_v8, %v2483_v52 }
 0x3ed   : > { %2510 = vst [vmem:[%s4786_s20 + $0x48] sm:$0xff] %v2484_v30 }
 0x3f2   : > { %v2486_v19 = vpop.f32.mrf.mxu0 }
 0x3f3   : > { %v2487_v22 = vadd.f32 %v3749_v8, %v2486_v19 }
 0x3f5   : > { %2511 = vst [vmem:[%s4786_s20 + $0x50] sm:$0xff] %v2487_v22 }
 0x3fa   : > { %v2488_v7 = vpop.f32.mrf.mxu0 }
 0x3fb   : > { %v2489_v21 = vadd.f32 %v3749_v8, %v2488_v7 }
 0x3fd   : > { %2512 = vst [vmem:[%s4786_s20 + $0x58] sm:$0xff] %v2489_v21 }
 0x402   : > { %v2491_v9 = vpop.f32.mrf.mxu0 }
 0x403   : > { %v2492_v3 = vadd.f32 %v3749_v8, %v2491_v9 }
 0x405   : > { %2513 = vst [vmem:[%s4786_s20 + $0x60] sm:$0xff] %v2492_v3 }
 0x40a   : > { %v2493_v62 = vpop.f32.mrf.mxu0 }
 0x40b   : > { %v2494_v25 = vadd.f32 %v3749_v8, %v2493_v62 }
 0x40d   : > { %2514 = vst [vmem:[%s4786_s20 + $0x68] sm:$0xff] %v2494_v25 }
 0x412   : > { %v2496_v34 = vpop.f32.mrf.mxu0 }
 0x413   : > { %v2497_v13 = vadd.f32 %v3749_v8, %v2496_v34 }
 0x415   : > { %2515 = vst [vmem:[%s4786_s20 + $0x70] sm:$0xff] %v2497_v13 }
 0x41a   : > { %v2498_v59 = vpop.f32.mrf.mxu0 }
 0x41b   : > { %v2499_v56 = vadd.f32 %v3749_v8, %v2498_v59 }
 0x41d   : > { %2516 = vst [vmem:[%s4786_s20 + $0x78] sm:$0xff] %v2499_v56 }
 0x41e   : > { %3927 = shalt.err (!%p3924_p10)
}
 0x41f   : > { %s3986_s2 = smov 128   ;;  %s3987_s19 = smov 8  }
 0x420   : > { %3671 = dma.vmem_to_hbm [thread:$0]  (%p4112_p3), %s2531_s23, 2048, %s2533_s11, %s2518_s15, %s3986_s2, %s3986_s2, %s3987_s19  }
 0x421 PF: > { %s2547_s18 = sand.u32 1, %s3962_s24   ;;  %p4915_p12 = scmp.ge.s32.totalorder %s3974_s27, 2 }
 0x422   : > { %s2548_s20 = scalar_lea.sflag [#allocation4], %s2547_s18 }
 0x423   : > { %p3691_p13 = pnand %p4915_p12, %p4063_p6 }
 0x425   : > { %p3692_p0 = pneg %p3691_p13 }
 0x427   : > { %3957 = dma.done.wait (%p3692_p0), %s2548_s20, 2048  }
 0x428   : > { %3959 = vsyncadd (%p3692_p0), %s2548_s20, 4294965248  ;;  %p22_p5 = scmp.ge.s32.totalorder %s4102_s21, 4   ;;  %s4916_s24 = smov %s3966_s25 }
 0x429   : > { %s4917_s25 = smov %s3970_s26  ;;  %s4918_s26 = smov %s4118_s13 }
 0x42a   : > { %s4919_s27 = smov %s4102_s21  ;;  %24 = sbr.rel (!%p22_p5) target bundleno = 11 (0xb), region = 109 }
 0x42f   :  { %2554 = vsyncpa [#allocation3], 1 }
 0x430   :  { %2556 = vsyncpa [#allocation3 + $0x1], 1 }
 0x431   :  { %2557 = vsyncpa [#allocation6], 1 }
 0x432   :  { %2558 = vsyncpa [#allocation9], 1 }
 0x433   :  { %2559 = vsyncpa [#allocation4], 1 }
 0x434   :  { %2561 = vsyncpa [#allocation4 + $0x1], 1 }

</bundles_post_ra>
